<compile_context>
chip_gen: v5e
topology: v5e:2x2
jax: 0.10.0
libtpu: 0.0.40
codegen_flags: <defaults>
</compile_context>

<pallas_src>
import functools

import numpy as np
import jax
import jax.numpy as jnp
from jax.experimental import pallas as pl
from jax.experimental.pallas import tpu as pltpu

# ---------------------------------------------------------------------------
# Model dims (small, synthetic)
# ---------------------------------------------------------------------------
B, C_IN, H, W = 2, 4, 16, 16
C_ENC, C_NECK = 32, 32
N_CHANGE, N_SEM = 2, 7

K_IM2COL = 9 * C_IN                 # 36
HO = (H + 2 - 3) // 2 + 1           # 8   (stride-2, pad-1, k=3)
WO = (W + 2 - 3) // 2 + 1           # 8
M_HALF = HO * WO                    # 64 rows per image per batch element
HW_OUT = H * W                      # 256 upsampled pixels
C_PACK = 128                        # lane-dense packed logit channels
# packed channel layout: [0:2]=change, [2:9]=sem(x1), [9:16]=sem(x2), rest zero
OFF_CHG, OFF_S1, OFF_S2 = 0, N_CHANGE, N_CHANGE + N_SEM


# ---------------------------------------------------------------------------
# The fused kernel: one grid step = one block of `bt` batch elements.
# Row layout inside a block: [branch-1 rows of all bt images, branch-2 rows].
# ---------------------------------------------------------------------------
def _scdnet_fused_kernel(cols_ref, w_enc_ref, b_enc_ref,
                         w_neck_ref, b_neck_ref,
                         w_chg_ref, b_chg_ref,
                         w_head_ref, b_head_ref, u_t_ref,
                         o_ref, *, bt, m_half):
    cols = cols_ref[0]                                               # (2*bt*m_half, 36) bf16

    # encoder: shared 3x3/s2 conv as ONE matmul over both branches and all batch
    # elements of this block. bf16 MXU operands, f32 accumulation; bias/ReLU in f32.
    f = jnp.dot(cols, w_enc_ref[...], preferred_element_type=jnp.float32)
    f = jnp.maximum(f + b_enc_ref[...], 0.0)                         # (2*half, C_ENC) f32

    # neck: shared 1x1 conv + ReLU on everything at once
    n = jnp.dot(f.astype(jnp.bfloat16), w_neck_ref[...],
                preferred_element_type=jnp.float32)
    n = jnp.maximum(n + b_neck_ref[...], 0.0)                        # (2*half, C_NECK) f32

    half = bt * m_half
    n1 = n[:half]                                                    # branch 1 (all images)
    n2 = n[half:]                                                    # branch 2 (all images)

    # change branch: ReLU(|n1 - n2| @ Wc + bc)
    chg = jnp.dot(jnp.abs(n1 - n2).astype(jnp.bfloat16), w_chg_ref[...],
                  preferred_element_type=jnp.float32)
    chg = jnp.maximum(chg + b_chg_ref[...], 0.0)                     # (half, C_NECK) f32

    # all three heads fused into ONE MXU op:
    #   [n1 | n2 | chg] (half, 96) @ [Ws@lanes[2:9]; Ws@lanes[9:16]; Wc@lanes[0:2]]
    lhs = jnp.concatenate([n1, n2, chg], axis=-1).astype(jnp.bfloat16)   # (half, 96)
    logits = jnp.dot(lhs, w_head_ref[...],
                     preferred_element_type=jnp.float32) + b_head_ref[...]  # (half, 128)

    # channel-major bilinear upsample (align_corners=True):
    #   out[c, p] = sum_m logits[m, c] * U[p, m]  ==  (logits^T @ U^T)[c, p]
    # One XLU transpose, then a lane-dense N=256 MXU matmul per image.
    logits_t = logits.T.astype(jnp.bfloat16)                         # (128, half)
    for b in range(bt):                                              # static, tiny (bt<=2)
        lt = logits_t[:, b * m_half:(b + 1) * m_half]                # (128, m_half)
        up = jnp.dot(lt, u_t_ref[...], preferred_element_type=jnp.float32)  # (128, H*W)
        o_ref[b] = up.astype(o_ref.dtype)                            # lane-dense bf16 store


def scdnet_fused(cols, w_enc, b_enc, w_neck, b_neck, w_chg, b_chg,
                 w_head, b_head, u_t):
    nb, rows, k = cols.shape
    bt = rows // (2 * M_HALF)
    hw = u_t.shape[1]

    def full(shape):
        return pl.BlockSpec(shape, lambda g: (0,) * len(shape))

    return pl.pallas_call(
        functools.partial(_scdnet_fused_kernel, bt=bt, m_half=M_HALF),
        out_shape=jax.ShapeDtypeStruct((nb * bt, C_PACK, hw), jnp.bfloat16),
        grid_spec=pl.GridSpec(
            grid=(nb,),
            in_specs=[
                pl.BlockSpec((1, rows, k), lambda g: (g, 0, 0)),     # im2col rows
                full(w_enc.shape), full(b_enc.shape),                # encoder
                full(w_neck.shape), full(b_neck.shape),              # neck (shared)
                full(w_chg.shape), full(b_chg.shape),                # change conv
                full(w_head.shape), full(b_head.shape),              # fused packed heads
                full(u_t.shape),                                     # bilinear operator U^T
            ],
            out_specs=pl.BlockSpec((bt, C_PACK, hw), lambda g: (g, 0, 0)),
        ),
        compiler_params=pltpu.CompilerParams(
            dimension_semantics=("parallel",)),                      # 2 TCs on v7x
    )(cols, w_enc, b_enc, w_neck, b_neck, w_chg, b_chg, w_head, b_head, u_t)


# ---------------------------------------------------------------------------
# JAX glue: im2col for the 3x3/stride-2 encoder conv (tiny, one-time layout op)
# TODO(synk): could be folded into the kernel with 9 shifted pl.ds loads from a
# padded NHWC block; kept XLA-side since the gather is ~18 KiB per image.
# ---------------------------------------------------------------------------
def im2col_3x3_s2(x_nhwc):
    pad, k, s = 1, 3, 2
    x = jnp.pad(x_nhwc, ((0, 0), (pad, pad), (pad, pad), (0, 0)))
    b, hp, wp, c = x.shape
    ho = (hp - k) // s + 1
    wo = (wp - k) // s + 1
    patches = []
    for di in range(k):
        for dj in range(k):
            patches.append(x[:, di:di + ho * s:s, dj:dj + wo * s:s, :])
    cols = jnp.stack(patches, axis=-2)                  # (B, Ho, Wo, 9, C)
    return cols.reshape(b, ho * wo, k * k * c), (ho, wo)


# ---------------------------------------------------------------------------
# Bilinear interpolation operator (align_corners=True), precomputed on host
# TODO(synk): if H/W scale up, switch to the separable (Rw then Lh) form on v5e.
# ---------------------------------------------------------------------------
def _interp_matrix_np(n_out, n_in):
    m = np.zeros((n_out, n_in), np.float32)
    if n_in == 1 or n_out == 1:
        m[:, 0] = 1.0
        return m
    src = np.arange(n_out, dtype=np.float64) * (n_in - 1) / (n_out - 1)
    lo = np.clip(np.floor(src).astype(np.int64), 0, n_in - 2)
    frac = (src - lo).astype(np.float32)
    m[np.arange(n_out), lo] = 1.0 - frac
    m[np.arange(n_out), lo + 1] = frac
    return m


def _upsample_matrix(h_out, w_out, h_in, w_in):
    lh = _interp_matrix_np(h_out, h_in)                  # (Hout, Hin)
    rw = _interp_matrix_np(w_out, w_in)                  # (Wout, Win)
    # U[(oh*Wout+ow), (h*Win+w)] = Lh[oh,h] * Rw[ow,w]
    return jnp.asarray(np.kron(lh, rw))                  # (Hout*Wout, Hin*Win)


# ---------------------------------------------------------------------------
# Deterministic parameter init (synthetic weights, PyTorch shapes)
# ---------------------------------------------------------------------------
def init_params():
    keys = jax.random.split(jax.random.PRNGKey(0), 12)
    sc = 0.1
    # encoder conv: torch layout (Cout, Cin, 3, 3) -> matmul layout (9*Cin, Cout)
    w_enc_t = jax.random.normal(keys[0], (C_ENC, C_IN, 3, 3), jnp.float32) * sc
    w_enc = jnp.transpose(w_enc_t, (2, 3, 1, 0)).reshape(9 * C_IN, C_ENC)
    b_enc = jax.random.normal(keys[1], (C_ENC,), jnp.float32) * sc
    w_neck = jax.random.normal(keys[2], (C_ENC, C_NECK), jnp.float32) * sc
    b_neck = jax.random.normal(keys[3], (C_NECK,), jnp.float32) * sc
    w_chg = jax.random.normal(keys[4], (C_NECK, C_NECK), jnp.float32) * sc
    b_chg = jax.random.normal(keys[5], (C_NECK,), jnp.float32) * sc
    w_hc = jax.random.normal(keys[6], (C_NECK, N_CHANGE), jnp.float32) * sc
    b_hc = jax.random.normal(keys[7], (N_CHANGE,), jnp.float32) * sc
    w_hs = jax.random.normal(keys[8], (C_NECK, N_SEM), jnp.float32) * sc
    b_hs = jax.random.normal(keys[9], (N_SEM,), jnp.float32) * sc
    return dict(w_enc=w_enc, b_enc=b_enc, w_neck=w_neck, b_neck=b_neck,
                w_chg=w_chg, b_chg=b_chg, w_hc=w_hc, b_hc=b_hc,
                w_hs=w_hs, b_hs=b_hs)


# ---------------------------------------------------------------------------
# One-time parameter preprocessing (hoisted out of the per-call hot path):
# bf16 MXU weights, fused/packed head matrix + bias, bilinear operator U^T.
# ---------------------------------------------------------------------------
def prepare_params(params):
    bf16 = jnp.bfloat16
    wh_s1 = jnp.zeros((C_NECK, C_PACK), jnp.float32)\
        .at[:, OFF_S1:OFF_S1 + N_SEM].set(params['w_hs'])
    wh_s2 = jnp.zeros((C_NECK, C_PACK), jnp.float32)\
        .at[:, OFF_S2:OFF_S2 + N_SEM].set(params['w_hs'])
    wh_c = jnp.zeros((C_NECK, C_PACK), jnp.float32)\
        .at[:, OFF_CHG:OFF_CHG + N_CHANGE].set(params['w_hc'])
    w_head = jnp.concatenate([wh_s1, wh_s2, wh_c], axis=0).astype(bf16)   # (96, 128)
    b_head = (jnp.zeros((1, C_PACK), jnp.float32)
              .at[0, OFF_CHG:OFF_CHG + N_CHANGE].set(params['b_hc'])
              .at[0, OFF_S1:OFF_S1 + N_SEM].set(params['b_hs'])
              .at[0, OFF_S2:OFF_S2 + N_SEM].set(params['b_hs']))
    u_t = _upsample_matrix(H, W, HO, WO).T.astype(bf16)                    # (64, 256)
    return dict(
        w_enc=params['w_enc'].astype(bf16),
        b_enc=params['b_enc'].reshape(1, -1),          # biases stay f32 (v5e VPU)
        w_neck=params['w_neck'].astype(bf16),
        b_neck=params['b_neck'].reshape(1, -1),
        w_chg=params['w_chg'].astype(bf16),
        b_chg=params['b_chg'].reshape(1, -1),
        w_head=w_head, b_head=b_head, u_t=u_t)


def _num_grid_blocks(batch):
    # v7x has 2 TensorCores per chip -> keep a 2-way "parallel" grid axis.
    # Single-TC v5e/v6e: one grid step with batch folded into the matmul M dim.
    try:
        if "v7" in jax.devices()[0].device_kind.lower() and batch % 2 == 0:
            return 2
    except Exception:
        pass
    return 1


# ---------------------------------------------------------------------------
# SCDNet forward (NCHW in / NCHW out, like the PyTorch module)
# ---------------------------------------------------------------------------
def scdnet_forward(packed, x1_nchw, x2_nchw, *, num_blocks=1):
    b_total, _, h_in, w_in = x1_nchw.shape
    x1 = jnp.transpose(x1_nchw, (0, 2, 3, 1))            # NHWC
    x2 = jnp.transpose(x2_nchw, (0, 2, 3, 1))

    c1, (ho, wo) = im2col_3x3_s2(x1)                     # (B, Ho*Wo, 36)
    c2, _ = im2col_3x3_s2(x2)

    nb = num_blocks
    bt = b_total // nb
    k = c1.shape[-1]
    # Per grid block: branch-1 rows of its bt images first, then branch-2 rows,
    # so encoder+neck run as one big matmul and the change-split is a row split.
    cols = jnp.concatenate([c1.reshape(nb, bt, ho * wo, k),
                            c2.reshape(nb, bt, ho * wo, k)], axis=1)
    cols = cols.reshape(nb, 2 * bt * ho * wo, k).astype(jnp.bfloat16)

    out = scdnet_fused(cols,
                       packed['w_enc'], packed['b_enc'],
                       packed['w_neck'], packed['b_neck'],
                       packed['w_chg'], packed['b_chg'],
                       packed['w_head'], packed['b_head'],
                       packed['u_t'])                    # (B, 128, H*W) bf16, channel-major

    out = out.astype(jnp.float32)
    chg = out[:, OFF_CHG:OFF_CHG + N_CHANGE, :].reshape(b_total, N_CHANGE, h_in, w_in)
    s1 = out[:, OFF_S1:OFF_S1 + N_SEM, :].reshape(b_total, N_SEM, h_in, w_in)
    s2 = out[:, OFF_S2:OFF_S2 + N_SEM, :].reshape(b_total, N_SEM, h_in, w_in)
    return chg, s1, s2


if __name__ == "__main__":
    key = jax.random.PRNGKey(0)
    k1, k2 = jax.random.split(key)
    x1 = jax.random.normal(k1, (B, C_IN, H, W), jnp.float32)
    x2 = jax.random.normal(k2, (B, C_IN, H, W), jnp.float32)

    params = init_params()
    packed = prepare_params(params)                      # one-time packing
    nb = _num_grid_blocks(B)
    fwd = jax.jit(functools.partial(scdnet_forward, num_blocks=nb))

    change, s1, s2 = fwd(packed, x1, x2)
    jax.block_until_ready((change, s1, s2))

    assert change.shape == (B, N_CHANGE, H, W)
    assert s1.shape == (B, N_SEM, H, W)
    assert s2.shape == (B, N_SEM, H, W)
    assert bool(jnp.isfinite(change).all()) and bool(jnp.isfinite(s1).all()) \
        and bool(jnp.isfinite(s2).all())
    print("KERNEL_OK")
</pallas_src>

<mosaic_0001>
module attributes {stable_mosaic.version = 11 : i64} {
  func.func @_scdnet_fused_kernel(%arg0: i32, %arg1: memref<1x256x36xbf16, #tpu.memory_space<vmem>>, %arg2: memref<36x32xbf16, #tpu.memory_space<vmem>>, %arg3: memref<1x32xf32, #tpu.memory_space<vmem>>, %arg4: memref<32x32xbf16, #tpu.memory_space<vmem>>, %arg5: memref<1x32xf32, #tpu.memory_space<vmem>>, %arg6: memref<32x32xbf16, #tpu.memory_space<vmem>>, %arg7: memref<1x32xf32, #tpu.memory_space<vmem>>, %arg8: memref<96x128xbf16, #tpu.memory_space<vmem>>, %arg9: memref<1x128xf32, #tpu.memory_space<vmem>>, %arg10: memref<64x256xbf16, #tpu.memory_space<vmem>>, %arg11: memref<2x128x256xbf16, #tpu.memory_space<vmem>>) attributes {dimension_semantics = [#tpu.dimension_semantics<parallel>], iteration_bounds = array<i64: 1>, scalar_prefetch = 0 : i64, scratch_operands = 0 : i64, tpu.core_type = #tpu.core_type<tc>, window_params = [{transform_indices = @transform_0, window_bounds = array<i64: 1, 256, 36>}, {pipeline_mode = #tpu.pipeline_mode<synchronous>, transform_indices = @transform_1, window_bounds = array<i64: 36, 32>}, {pipeline_mode = #tpu.pipeline_mode<synchronous>, transform_indices = @transform_2, window_bounds = array<i64: 1, 32>}, {pipeline_mode = #tpu.pipeline_mode<synchronous>, transform_indices = @transform_3, window_bounds = array<i64: 32, 32>}, {pipeline_mode = #tpu.pipeline_mode<synchronous>, transform_indices = @transform_4, window_bounds = array<i64: 1, 32>}, {pipeline_mode = #tpu.pipeline_mode<synchronous>, transform_indices = @transform_5, window_bounds = array<i64: 32, 32>}, {pipeline_mode = #tpu.pipeline_mode<synchronous>, transform_indices = @transform_6, window_bounds = array<i64: 1, 32>}, {pipeline_mode = #tpu.pipeline_mode<synchronous>, transform_indices = @transform_7, window_bounds = array<i64: 96, 128>}, {pipeline_mode = #tpu.pipeline_mode<synchronous>, transform_indices = @transform_8, window_bounds = array<i64: 1, 128>}, {pipeline_mode = #tpu.pipeline_mode<synchronous>, transform_indices = @transform_9, window_bounds = array<i64: 64, 256>}, {transform_indices = @transform_10, window_bounds = array<i64: 2, 128, 256>}]} {
    %c0 = arith.constant 0 : index
    %c0_0 = arith.constant 0 : index
    %c0_1 = arith.constant 0 : index
    %0 = vector.load %arg1[%c0, %c0_0, %c0_1] : memref<1x256x36xbf16, #tpu.memory_space<vmem>>, vector<1x256x36xbf16>
    %1 = vector.shape_cast %0 : vector<1x256x36xbf16> to vector<256x36xbf16>
    %c0_2 = arith.constant 0 : index
    %c0_3 = arith.constant 0 : index
    %2 = vector.load %arg2[%c0_2, %c0_3] : memref<36x32xbf16, #tpu.memory_space<vmem>>, vector<36x32xbf16>
    %cst = arith.constant dense<0.000000e+00> : vector<256x32xf32>
    %3 = tpu.matmul %1, %2, %cst {dimension_numbers = #tpu.dot_dimension_numbers<[1], [0], [0], [1], [0, 0, 1, 1], [], []>} : vector<256x36xbf16>, vector<36x32xbf16>, vector<256x32xf32> -> vector<256x32xf32>
    %c0_4 = arith.constant 0 : index
    %c0_5 = arith.constant 0 : index
    %4 = vector.load %arg3[%c0_4, %c0_5] : memref<1x32xf32, #tpu.memory_space<vmem>>, vector<1x32xf32>
    %5 = vector.broadcast %4 : vector<1x32xf32> to vector<256x32xf32>
    %6 = arith.addf %3, %5 : vector<256x32xf32>
    %cst_6 = arith.constant 0.000000e+00 : f32
    %7 = vector.broadcast %cst_6 : f32 to vector<256x32xf32>
    %8 = arith.maximumf %6, %7 : vector<256x32xf32>
    %9 = arith.truncf %8 : vector<256x32xf32> to vector<256x32xbf16>
    %c0_7 = arith.constant 0 : index
    %c0_8 = arith.constant 0 : index
    %10 = vector.load %arg4[%c0_7, %c0_8] : memref<32x32xbf16, #tpu.memory_space<vmem>>, vector<32x32xbf16>
    %cst_9 = arith.constant dense<0.000000e+00> : vector<256x32xf32>
    %11 = tpu.matmul %9, %10, %cst_9 {dimension_numbers = #tpu.dot_dimension_numbers<[1], [0], [0], [1], [0, 0, 1, 1], [], []>} : vector<256x32xbf16>, vector<32x32xbf16>, vector<256x32xf32> -> vector<256x32xf32>
    %c0_10 = arith.constant 0 : index
    %c0_11 = arith.constant 0 : index
    %12 = vector.load %arg5[%c0_10, %c0_11] : memref<1x32xf32, #tpu.memory_space<vmem>>, vector<1x32xf32>
    %13 = vector.broadcast %12 : vector<1x32xf32> to vector<256x32xf32>
    %14 = arith.addf %11, %13 : vector<256x32xf32>
    %cst_12 = arith.constant 0.000000e+00 : f32
    %15 = vector.broadcast %cst_12 : f32 to vector<256x32xf32>
    %16 = arith.maximumf %14, %15 : vector<256x32xf32>
    %17 = vector.extract_strided_slice %16 {offsets = [0, 0], sizes = [128, 32], strides = [1, 1]} : vector<256x32xf32> to vector<128x32xf32>
    %18 = vector.extract_strided_slice %16 {offsets = [128, 0], sizes = [128, 32], strides = [1, 1]} : vector<256x32xf32> to vector<128x32xf32>
    %19 = arith.subf %17, %18 : vector<128x32xf32>
    %20 = math.absf %19 : vector<128x32xf32>
    %21 = arith.truncf %20 : vector<128x32xf32> to vector<128x32xbf16>
    %c0_13 = arith.constant 0 : index
    %c0_14 = arith.constant 0 : index
    %22 = vector.load %arg6[%c0_13, %c0_14] : memref<32x32xbf16, #tpu.memory_space<vmem>>, vector<32x32xbf16>
    %cst_15 = arith.constant dense<0.000000e+00> : vector<128x32xf32>
    %23 = tpu.matmul %21, %22, %cst_15 {dimension_numbers = #tpu.dot_dimension_numbers<[1], [0], [0], [1], [0, 0, 1, 1], [], []>} : vector<128x32xbf16>, vector<32x32xbf16>, vector<128x32xf32> -> vector<128x32xf32>
    %c0_16 = arith.constant 0 : index
    %c0_17 = arith.constant 0 : index
    %24 = vector.load %arg7[%c0_16, %c0_17] : memref<1x32xf32, #tpu.memory_space<vmem>>, vector<1x32xf32>
    %25 = vector.broadcast %24 : vector<1x32xf32> to vector<128x32xf32>
    %26 = arith.addf %23, %25 : vector<128x32xf32>
    %cst_18 = arith.constant 0.000000e+00 : f32
    %27 = vector.broadcast %cst_18 : f32 to vector<128x32xf32>
    %28 = arith.maximumf %26, %27 : vector<128x32xf32>
    %29 = tpu.concatenate %17, %18, %28 in 1 : vector<128x32xf32>, vector<128x32xf32>, vector<128x32xf32> -> vector<128x96xf32>
    %30 = arith.truncf %29 : vector<128x96xf32> to vector<128x96xbf16>
    %c0_19 = arith.constant 0 : index
    %c0_20 = arith.constant 0 : index
    %31 = vector.load %arg8[%c0_19, %c0_20] : memref<96x128xbf16, #tpu.memory_space<vmem>>, vector<96x128xbf16>
    %cst_21 = arith.constant dense<0.000000e+00> : vector<128x128xf32>
    %32 = tpu.matmul %30, %31, %cst_21 {dimension_numbers = #tpu.dot_dimension_numbers<[1], [0], [0], [1], [0, 0, 1, 1], [], []>} : vector<128x96xbf16>, vector<96x128xbf16>, vector<128x128xf32> -> vector<128x128xf32>
    %c0_22 = arith.constant 0 : index
    %c0_23 = arith.constant 0 : index
    %33 = vector.load %arg9[%c0_22, %c0_23] : memref<1x128xf32, #tpu.memory_space<vmem>>, vector<1x128xf32>
    %34 = vector.broadcast %33 : vector<1x128xf32> to vector<128x128xf32>
    %35 = arith.addf %32, %34 : vector<128x128xf32>
    %36 = tpu.transpose %35, [1, 0] : vector<128x128xf32> -> vector<128x128xf32>
    %37 = arith.truncf %36 : vector<128x128xf32> to vector<128x128xbf16>
    %38 = vector.extract_strided_slice %37 {offsets = [0, 0], sizes = [128, 64], strides = [1, 1]} : vector<128x128xbf16> to vector<128x64xbf16>
    %c0_24 = arith.constant 0 : index
    %c0_25 = arith.constant 0 : index
    %39 = vector.load %arg10[%c0_24, %c0_25] : memref<64x256xbf16, #tpu.memory_space<vmem>>, vector<64x256xbf16>
    %cst_26 = arith.constant dense<0.000000e+00> : vector<128x256xf32>
    %40 = tpu.matmul %38, %39, %cst_26 {dimension_numbers = #tpu.dot_dimension_numbers<[1], [0], [0], [1], [0, 0, 1, 1], [], []>} : vector<128x64xbf16>, vector<64x256xbf16>, vector<128x256xf32> -> vector<128x256xf32>
    %41 = arith.truncf %40 : vector<128x256xf32> to vector<128x256xbf16>
    %c0_27 = arith.constant 0 : index
    %c0_28 = arith.constant 0 : index
    %c0_29 = arith.constant 0 : index
    %42 = vector.load %arg11[%c0_27, %c0_28, %c0_29] : memref<2x128x256xbf16, #tpu.memory_space<vmem>>, vector<1x128x256xbf16>
    %43 = vector.shape_cast %42 : vector<1x128x256xbf16> to vector<128x256xbf16>
    %44 = vector.shape_cast %41 : vector<128x256xbf16> to vector<1x128x256xbf16>
    tpu.vector_store %arg11[%c0_27, %c0_28, %c0_29], %44 {strides = array<i32>} : memref<2x128x256xbf16, #tpu.memory_space<vmem>>, vector<1x128x256xbf16>,
    %45 = vector.extract_strided_slice %37 {offsets = [0, 64], sizes = [128, 64], strides = [1, 1]} : vector<128x128xbf16> to vector<128x64xbf16>
    %c0_30 = arith.constant 0 : index
    %c0_31 = arith.constant 0 : index
    %46 = vector.load %arg10[%c0_30, %c0_31] : memref<64x256xbf16, #tpu.memory_space<vmem>>, vector<64x256xbf16>
    %cst_32 = arith.constant dense<0.000000e+00> : vector<128x256xf32>
    %47 = tpu.matmul %45, %46, %cst_32 {dimension_numbers = #tpu.dot_dimension_numbers<[1], [0], [0], [1], [0, 0, 1, 1], [], []>} : vector<128x64xbf16>, vector<64x256xbf16>, vector<128x256xf32> -> vector<128x256xf32>
    %48 = arith.truncf %47 : vector<128x256xf32> to vector<128x256xbf16>
    %c1 = arith.constant 1 : index
    %c0_33 = arith.constant 0 : index
    %c0_34 = arith.constant 0 : index
    %49 = vector.load %arg11[%c1, %c0_33, %c0_34] : memref<2x128x256xbf16, #tpu.memory_space<vmem>>, vector<1x128x256xbf16>
    %50 = vector.shape_cast %49 : vector<1x128x256xbf16> to vector<128x256xbf16>
    %51 = vector.shape_cast %48 : vector<128x256xbf16> to vector<1x128x256xbf16>
    tpu.vector_store %arg11[%c1, %c0_33, %c0_34], %51 {strides = array<i32>} : memref<2x128x256xbf16, #tpu.memory_space<vmem>>, vector<1x128x256xbf16>,
    return
  }
  func.func @transform_0(%arg0: i32) -> (i32, i32, i32) {
    %c0_i32 = arith.constant 0 : i32
    %c0_i32_0 = arith.constant 0 : i32
    %c0_i32_1 = arith.constant 0 : i32
    return %arg0, %c0_i32, %c0_i32_0 : i32, i32, i32
  }
  func.func @transform_1(%arg0: i32) -> (i32, i32) {
    %c0_i32 = arith.constant 0 : i32
    %c0_i32_0 = arith.constant 0 : i32
    %c0_i32_1 = arith.constant 0 : i32
    return %c0_i32, %c0_i32_0 : i32, i32
  }
  func.func @transform_2(%arg0: i32) -> (i32, i32) {
    %c0_i32 = arith.constant 0 : i32
    %c0_i32_0 = arith.constant 0 : i32
    %c0_i32_1 = arith.constant 0 : i32
    return %c0_i32, %c0_i32_0 : i32, i32
  }
  func.func @transform_3(%arg0: i32) -> (i32, i32) {
    %c0_i32 = arith.constant 0 : i32
    %c0_i32_0 = arith.constant 0 : i32
    %c0_i32_1 = arith.constant 0 : i32
    return %c0_i32, %c0_i32_0 : i32, i32
  }
  func.func @transform_4(%arg0: i32) -> (i32, i32) {
    %c0_i32 = arith.constant 0 : i32
    %c0_i32_0 = arith.constant 0 : i32
    %c0_i32_1 = arith.constant 0 : i32
    return %c0_i32, %c0_i32_0 : i32, i32
  }
  func.func @transform_5(%arg0: i32) -> (i32, i32) {
    %c0_i32 = arith.constant 0 : i32
    %c0_i32_0 = arith.constant 0 : i32
    %c0_i32_1 = arith.constant 0 : i32
    return %c0_i32, %c0_i32_0 : i32, i32
  }
  func.func @transform_6(%arg0: i32) -> (i32, i32) {
    %c0_i32 = arith.constant 0 : i32
    %c0_i32_0 = arith.constant 0 : i32
    %c0_i32_1 = arith.constant 0 : i32
    return %c0_i32, %c0_i32_0 : i32, i32
  }
  func.func @transform_7(%arg0: i32) -> (i32, i32) {
    %c0_i32 = arith.constant 0 : i32
    %c0_i32_0 = arith.constant 0 : i32
    %c0_i32_1 = arith.constant 0 : i32
    return %c0_i32, %c0_i32_0 : i32, i32
  }
  func.func @transform_8(%arg0: i32) -> (i32, i32) {
    %c0_i32 = arith.constant 0 : i32
    %c0_i32_0 = arith.constant 0 : i32
    %c0_i32_1 = arith.constant 0 : i32
    return %c0_i32, %c0_i32_0 : i32, i32
  }
  func.func @transform_9(%arg0: i32) -> (i32, i32) {
    %c0_i32 = arith.constant 0 : i32
    %c0_i32_0 = arith.constant 0 : i32
    %c0_i32_1 = arith.constant 0 : i32
    return %c0_i32, %c0_i32_0 : i32, i32
  }
  func.func @transform_10(%arg0: i32) -> (i32, i32, i32) {
    %c0_i32 = arith.constant 0 : i32
    %c0_i32_0 = arith.constant 0 : i32
    %c0_i32_1 = arith.constant 0 : i32
    return %arg0, %c0_i32, %c0_i32_0 : i32, i32, i32
  }
}

</mosaic_0001>

<bundles_post_ra>
// kernel: scdnet_forward.1
= control target key start
LH: loop header
LB: loop body
LE: loop exit
PB: predicated region body
PF: predicated region fallthrough
CT: control target
= control target key end

     0   :  { %vm221_vm0 = vcmask 1041408   ;;  %vm172_vm1 = vcmask 293888   ;;  %vm382_vm2 = vcmask 261120   ;;  %s1916_s19 = smov 64   ;;  %vm845_vm3 = vcmask 523264   ;;  %s2669_s1 = inlined_call_operand.vmem [shape: bf16[36,32], index: 1, kind: input, shape index: {}]   ;;  %s2670_s3 = inlined_call_operand.vmem [shape: bf16[32,32], index: 3, kind: input, shape index: {}]   ;;  %s2671_s2 = inlined_call_operand.vmem [shape: f32[1,32], index: 2, kind: input, shape index: {}]   ;;  %s2672_s0 = inlined_call_operand.vmem [shape: bf16[1,256,36], index: 0, kind: input, shape index: {}]   ;;  %s2673_s4 = inlined_call_operand.vmem [shape: f32[1,32], index: 4, kind: input, shape index: {}]   ;;  %s2674_s5 = inlined_call_operand.vmem [shape: bf16[32,32], index: 5, kind: input, shape index: {}]   ;;  %s2675_s6 = inlined_call_operand.vmem [shape: f32[1,32], index: 6, kind: input, shape index: {}]   ;;  %s2676_s7 = inlined_call_operand.vmem [shape: bf16[96,128], index: 7, kind: input, shape index: {}]   ;;  %s2677_s8 = inlined_call_operand.vmem [shape: f32[1,128], index: 8, kind: input, shape index: {}]   ;;  %s2678_s9 = inlined_call_operand.vmem [shape: bf16[64,256], index: 9, kind: input, shape index: {}]   ;;  %s2679_s10 = inlined_call_operand.vmem [shape: bf16[2,128,256], index: 10, kind: output, shape index: {}]  }
   0x1   :  { %v72_v0 = vld [vmem:[%s2669_s1 + $0x10] sm:$0x3]  ;;  %v1800_v2 = vld [vmem:[%s2670_s3 + $0x8] sm:$0xff]  ;;  %v1797_v6 = vld [vmem:[%s2669_s1] sm:$0xff]  ;;  %vm922_vm4 = vcmask 785408  }
   0x2   :  { %v166_v1 = vunpack.c.l.b16 %v72_v0  ;;  %1825 = vmatpush.bf16.msra.mxu1 %v1800_v2  ;;  %v1798_v5 = vld [vmem:[%s2669_s1 + $0x8] sm:$0xff]  ;;  %v1781_v7 = vld [vmem:[%s2672_s0] sm:$0xff]  ;;  %v1783_v9 = vld [vmem:[%s2672_s0 + $0x10] sm:$0xff] }
   0x3   :  { %v1782_v8 = vld [vmem:[%s2672_s0 + $0x8] sm:$0xff]  ;;  %v1784_v10 = vld [vmem:[%s2672_s0 + $0x18] sm:$0xff]  ;;  %v1785_v11 = vld [vmem:[%s2672_s0 + $0x20] sm:$0xff] }
   0x4   :  { %v169_v3 = vpack.c.b16 %v166_v1, %v166_v1  ;;  %v1786_v12 = vld [vmem:[%s2672_s0 + $0x28] sm:$0xff]  ;;  %v1787_v13 = vld [vmem:[%s2672_s0 + $0x30] sm:$0xff]  ;;  %v1799_v14 = vld [vmem:[%s2670_s3] sm:$0xff] }
   0x5   :  { %v1788_v15 = vld [vmem:[%s2672_s0 + $0x38] sm:$0xff]  ;;  %v1789_v16 = vld [vmem:[%s2672_s0 + $0x40] sm:$0xff]  ;;  %v1790_v25 = vld [vmem:[%s2672_s0 + $0x48] sm:$0xff] }
   0x6   :  { %v223_v4 = vsel %vm221_vm0, %v169_v3, 0  ;;  %1826 = vmatpush.bf16.msra.mxu1 %v1799_v14  ;;  %v2025_v18 = vld [vmem:[%s2671_s2] ss:$0 sm:$0xff]  ;;  %v1791_v33 = vld [vmem:[%s2672_s0 + $0x50] sm:$0xff]  ;;  %v1792_v41 = vld [vmem:[%s2672_s0 + $0x58] sm:$0xff] }
   0x7   :  { %230 = vmatpush.bf16.msra.mxu0 %v223_v4  ;;  %v1793_v49 = vld [vmem:[%s2672_s0 + $0x60] sm:$0xff]  ;;  %v1794_v57 = vld [vmem:[%s2672_s0 + $0x68] sm:$0xff]  ;;  %v1795_v1 = vld [vmem:[%s2672_s0 + $0x70] sm:$0xff] }
   0xb   :  { %231 = vmatpush.bf16.msra.mxu0 %v1798_v5 }
   0xf   :  { %232 = vmatpush.bf16.msra.mxu0 %v1797_v6 }
  0x12   :  { %1581 = vmatmul.msk.bf16.vlgmr.msra.gmra.mxu0 %vm172_vm1, %v1781_v7 }
  0x13   :  { %437 = vmatpush.bf16.msrb.mxu0 %v1800_v2 }
  0x17   :  { %438 = vmatpush.bf16.msrb.mxu0 %v1799_v14 }
  0x22   :  { %1582 = vmatmul.msk.bf16.gmra.mxu0 %vm172_vm1, %v1782_v8 }
  0x32   :  { %1583 = vmatmul.msk.bf16.gmra.mxu0 %vm172_vm1, %v1783_v9  ;;  %v1796_v9 = vld [vmem:[%s2672_s0 + $0x78] sm:$0xff] }
  0x42   :  { %1584 = vmatmul.msk.bf16.gmra.mxu0 %vm172_vm1, %v1784_v10 }
  0x52   :  { %1585 = vmatmul.msk.bf16.gmra.mxu0 %vm172_vm1, %v1785_v11 }
  0x62   :  { %1586 = vmatmul.msk.bf16.gmra.mxu0 %vm172_vm1, %v1786_v12 }
  0x72   :  { %1587 = vmatmul.msk.bf16.gmra.mxu0 %vm172_vm1, %v1787_v13 }
  0x82   :  { %1588 = vmatmul.msk.bf16.gmra.mxu0 %vm172_vm1, %v1788_v15 }
  0x8f   :  { %v234_v17 = vpop.f32.mrf.mxu0 }
  0x90   :  { %v235_v19 = vadd.f32 %v2025_v18, %v234_v17 }
  0x92   :  { %1589 = vmatmul.msk.bf16.gmra.mxu0 %vm172_vm1, %v1789_v16  ;;  %v314_v22 = vmax.f32 %v235_v19, 0.0 }
  0x97   :  { %v236_v20 = vpop.f32.mrf.mxu0 }
  0x98   :  { %v237_v21 = vadd.f32 %v2025_v18, %v236_v20 }
  0x9a   :  { %v315_v23 = vmax.f32 %v237_v21, 0.0 }
  0x9c   :  { %v2030_v24 = vpack.c.bf16 %v315_v23, %v314_v22 }
  0x9f   :  { %v239_v26 = vpop.f32.mrf.mxu0 }
  0xa0   :  { %v240_v27 = vadd.f32 %v2025_v18, %v239_v26 }
  0xa2   :  { %1590 = vmatmul.msk.bf16.gmra.mxu0 %vm172_vm1, %v1790_v25  ;;  %v316_v30 = vmax.f32 %v240_v27, 0.0 }
  0xa7   :  { %v241_v28 = vpop.f32.mrf.mxu0 }
  0xa8   :  { %v242_v29 = vadd.f32 %v2025_v18, %v241_v28 }
  0xaa   :  { %v317_v31 = vmax.f32 %v242_v29, 0.0 }
  0xac   :  { %v2038_v32 = vpack.c.bf16 %v317_v31, %v316_v30 }
  0xaf   :  { %v244_v34 = vpop.f32.mrf.mxu0 }
  0xb0   :  { %v245_v35 = vadd.f32 %v2025_v18, %v244_v34 }
  0xb2   :  { %1591 = vmatmul.msk.bf16.gmra.mxu0 %vm172_vm1, %v1791_v33  ;;  %v318_v38 = vmax.f32 %v245_v35, 0.0 }
  0xb7   :  { %v246_v36 = vpop.f32.mrf.mxu0 }
  0xb8   :  { %v247_v37 = vadd.f32 %v2025_v18, %v246_v36 }
  0xba   :  { %v319_v39 = vmax.f32 %v247_v37, 0.0 }
  0xbc   :  { %v2046_v40 = vpack.c.bf16 %v319_v39, %v318_v38 }
  0xbf   :  { %v249_v42 = vpop.f32.mrf.mxu0 }
  0xc0   :  { %v250_v43 = vadd.f32 %v2025_v18, %v249_v42 }
  0xc2   :  { %1592 = vmatmul.msk.bf16.gmra.mxu0 %vm172_vm1, %v1792_v41  ;;  %v320_v46 = vmax.f32 %v250_v43, 0.0 }
  0xc7   :  { %v251_v44 = vpop.f32.mrf.mxu0 }
  0xc8   :  { %v252_v45 = vadd.f32 %v2025_v18, %v251_v44 }
  0xca   :  { %v321_v47 = vmax.f32 %v252_v45, 0.0 }
  0xcc   :  { %v349_v48 = vpack.c.bf16 %v321_v47, %v320_v46 }
  0xce   :  { %1608 = vmatmul.msk.bf16.vlgmr.msra.gmra.mxu1 %vm382_vm2, %v349_v48 }
  0xcf   :  { %v254_v50 = vpop.f32.mrf.mxu0 }
  0xd0   :  { %v255_v51 = vadd.f32 %v2025_v18, %v254_v50 }
  0xd2   :  { %1593 = vmatmul.msk.bf16.gmra.mxu0 %vm172_vm1, %v1793_v49  ;;  %v322_v54 = vmax.f32 %v255_v51, 0.0 }
  0xd7   :  { %v256_v52 = vpop.f32.mrf.mxu0 }
  0xd8   :  { %v257_v53 = vadd.f32 %v2025_v18, %v256_v52 }
  0xda   :  { %v323_v55 = vmax.f32 %v257_v53, 0.0 }
  0xdc   :  { %v350_v56 = vpack.c.bf16 %v323_v55, %v322_v54 }
  0xde   :  { %1609 = vmatmul.msk.bf16.gmra.mxu1 %vm382_vm2, %v350_v56 }
  0xdf   :  { %v259_v58 = vpop.f32.mrf.mxu0 }
  0xe0   :  { %v260_v59 = vadd.f32 %v2025_v18, %v259_v58 }
  0xe2   :  { %1594 = vmatmul.msk.bf16.gmra.mxu0 %vm172_vm1, %v1794_v57  ;;  %v324_v62 = vmax.f32 %v260_v59, 0.0 }
  0xe7   :  { %v261_v60 = vpop.f32.mrf.mxu0 }
  0xe8   :  { %v262_v61 = vadd.f32 %v2025_v18, %v261_v60 }
  0xea   :  { %v325_v63 = vmax.f32 %v262_v61, 0.0 }
  0xec   :  { %v351_v0 = vpack.c.bf16 %v325_v63, %v324_v62 }
  0xee   :  { %1610 = vmatmul.msk.bf16.gmra.mxu1 %vm382_vm2, %v351_v0 }
  0xef   :  { %v264_v2 = vpop.f32.mrf.mxu0 }
  0xf0   :  { %v265_v3 = vadd.f32 %v2025_v18, %v264_v2 }
  0xf2   :  { %1595 = vmatmul.msk.bf16.gmra.mxu0 %vm172_vm1, %v1795_v1  ;;  %v326_v6 = vmax.f32 %v265_v3, 0.0 }
  0xf7   :  { %v266_v4 = vpop.f32.mrf.mxu0 }
  0xf8   :  { %v267_v5 = vadd.f32 %v2025_v18, %v266_v4 }
  0xfa   :  { %v327_v7 = vmax.f32 %v267_v5, 0.0 }
  0xfc   :  { %v352_v8 = vpack.c.bf16 %v327_v7, %v326_v6 }
  0xfe   :  { %1611 = vmatmul.msk.bf16.gmra.mxu1 %vm382_vm2, %v352_v8 }
  0xff   :  { %v269_v10 = vpop.f32.mrf.mxu0 }
 0x100   :  { %v270_v11 = vadd.f32 %v2025_v18, %v269_v10 }
 0x102   :  { %1596 = vmatmul.msk.bf16.gmra.mxu0 %vm172_vm1, %v1796_v9  ;;  %v328_v14 = vmax.f32 %v270_v11, 0.0 }
 0x107   :  { %v271_v12 = vpop.f32.mrf.mxu0 }
 0x108   :  { %v272_v13 = vadd.f32 %v2025_v18, %v271_v12  ;;  %v1802_v12 = vld [vmem:[%s2674_s5 + $0x8] sm:$0xff] }
 0x109   :  { %642 = vmatpush.bf16.msra.mxu2 %v1802_v12  ;;  %1827 = vmatpush.bf16.msra.mxu3 %v1802_v12 }
 0x10a   :  { %v329_v15 = vmax.f32 %v272_v13, 0.0 }
 0x10c   :  { %v353_v16 = vpack.c.bf16 %v329_v15, %v328_v14 }
 0x10e   :  { %1612 = vmatmul.msk.bf16.gmra.mxu1 %vm382_vm2, %v353_v16  ;;  %v1801_v16 = vld [vmem:[%s2674_s5] sm:$0xff] }
 0x10f   :  { %v274_v17 = vpop.f32.mrf.mxu0  ;;  %643 = vmatpush.bf16.msra.mxu2 %v1801_v16  ;;  %1828 = vmatpush.bf16.msra.mxu3 %v1801_v16 }
 0x110   :  { %v275_v19 = vadd.f32 %v2025_v18, %v274_v17 }
 0x112   :  { %1605 = vmatmul.msk.bf16.vlgmr.msrb.gmra.mxu0 %vm382_vm2, %v2030_v24  ;;  %v330_v22 = vmax.f32 %v275_v19, 0.0 }
 0x117   :  { %v276_v20 = vpop.f32.mrf.mxu0 }
 0x118   :  { %v277_v21 = vadd.f32 %v2025_v18, %v276_v20 }
 0x11a   :  { %v331_v23 = vmax.f32 %v277_v21, 0.0 }
 0x11c   :  { %v354_v25 = vpack.c.bf16 %v331_v23, %v330_v22 }
 0x11e   :  { %1613 = vmatmul.msk.bf16.gmra.mxu1 %vm382_vm2, %v354_v25 }
 0x11f   :  { %v279_v26 = vpop.f32.mrf.mxu0 }
 0x120   :  { %v280_v27 = vadd.f32 %v2025_v18, %v279_v26 }
 0x122   :  { %1606 = vmatmul.msk.bf16.gmra.mxu0 %vm382_vm2, %v2038_v32  ;;  %v332_v24 = vmax.f32 %v280_v27, 0.0 }
 0x127   :  { %v281_v28 = vpop.f32.mrf.mxu0 }
 0x128   :  { %v282_v29 = vadd.f32 %v2025_v18, %v281_v28 }
 0x12a   :  { %v333_v30 = vmax.f32 %v282_v29, 0.0 }
 0x12c   :  { %v355_v31 = vpack.c.bf16 %v333_v30, %v332_v24 }
 0x12e   :  { %1614 = vmatmul.msk.bf16.gmra.mxu1 %vm382_vm2, %v355_v31 }
 0x12f   :  { %v284_v33 = vpop.f32.mrf.mxu0 }
 0x130   :  { %v285_v34 = vadd.f32 %v2025_v18, %v284_v33 }
 0x132   :  { %1607 = vmatmul.msk.bf16.gmra.mxu0 %vm382_vm2, %v2046_v40  ;;  %v334_v32 = vmax.f32 %v285_v34, 0.0 }
 0x137   :  { %v286_v35 = vpop.f32.mrf.mxu0 }
 0x138   :  { %v287_v36 = vadd.f32 %v2025_v18, %v286_v35 }
 0x13a   :  { %v335_v37 = vmax.f32 %v287_v36, 0.0 }
 0x13c   :  { %v356_v38 = vpack.c.bf16 %v335_v37, %v334_v32 }
 0x13e   :  { %1615 = vmatmul.msk.bf16.gmra.mxu1 %vm382_vm2, %v356_v38 }
 0x13f   :  { %v289_v39 = vpop.f32.mrf.mxu0 }
 0x140   :  { %v290_v41 = vadd.f32 %v2025_v18, %v289_v39 }
 0x142   :  { %v336_v44 = vmax.f32 %v290_v41, 0.0 }
 0x147   :  { %v291_v42 = vpop.f32.mrf.mxu0 }
 0x148   :  { %v292_v43 = vadd.f32 %v2025_v18, %v291_v42 }
 0x14a   :  { %v337_v45 = vmax.f32 %v292_v43, 0.0 }
 0x14b   :  { %v2100_v46 = vpop.f32.mrf.mxu1 }
 0x14c   :  { %v357_v40 = vpack.c.bf16 %v337_v45, %v336_v44 }
 0x14e   :  { %1616 = vmatmul.msk.bf16.gmra.mxu1 %vm382_vm2, %v357_v40 }
 0x14f   :  { %v294_v47 = vpop.f32.mrf.mxu0 }
 0x150   :  { %v295_v49 = vadd.f32 %v2025_v18, %v294_v47 }
 0x152   :  { %v338_v52 = vmax.f32 %v295_v49, 0.0 }
 0x153   :  { %v2103_v48 = vpop.f32.mrf.mxu1 }
 0x157   :  { %v296_v50 = vpop.f32.mrf.mxu0 }
 0x158   :  { %v297_v51 = vadd.f32 %v2025_v18, %v296_v50 }
 0x15a   :  { %v339_v53 = vmax.f32 %v297_v51, 0.0 }
 0x15b   :  { %v2107_v54 = vpop.f32.mrf.mxu1 }
 0x15c   :  { %v358_v55 = vpack.c.bf16 %v339_v53, %v338_v52 }
 0x15e   :  { %1617 = vmatmul.msk.bf16.gmra.mxu1 %vm382_vm2, %v358_v55 }
 0x15f   :  { %v299_v56 = vpop.f32.mrf.mxu0 }
 0x160   :  { %v300_v58 = vadd.f32 %v2025_v18, %v299_v56 }
 0x162   :  { %v340_v61 = vmax.f32 %v300_v58, 0.0 }
 0x163   :  { %v2110_v57 = vpop.f32.mrf.mxu1 }
 0x167   :  { %v301_v59 = vpop.f32.mrf.mxu0 }
 0x168   :  { %v302_v60 = vadd.f32 %v2025_v18, %v301_v59 }
 0x16a   :  { %v341_v62 = vmax.f32 %v302_v60, 0.0 }
 0x16b   :  { %v2114_v63 = vpop.f32.mrf.mxu1 }
 0x16c   :  { %v359_v0 = vpack.c.bf16 %v341_v62, %v340_v61 }
 0x16e   :  { %1618 = vmatmul.msk.bf16.gmra.mxu1 %vm382_vm2, %v359_v0 }
 0x16f   :  { %v304_v1 = vpop.f32.mrf.mxu0 }
 0x170   :  { %v305_v3 = vadd.f32 %v2025_v18, %v304_v1 }
 0x172   :  { %v342_v6 = vmax.f32 %v305_v3, 0.0 }
 0x173   :  { %v2117_v2 = vpop.f32.mrf.mxu1 }
 0x177   :  { %v306_v4 = vpop.f32.mrf.mxu0 }
 0x178   :  { %v307_v5 = vadd.f32 %v2025_v18, %v306_v4 }
 0x17a   :  { %v343_v7 = vmax.f32 %v307_v5, 0.0 }
 0x17b   :  { %v2121_v8 = vpop.f32.mrf.mxu1 }
 0x17c   :  { %v360_v9 = vpack.c.bf16 %v343_v7, %v342_v6 }
 0x17e   :  { %1619 = vmatmul.msk.bf16.gmra.mxu1 %vm382_vm2, %v360_v9 }
 0x17f   :  { %v309_v10 = vpop.f32.mrf.mxu0 }
 0x180   :  { %v310_v13 = vadd.f32 %v2025_v18, %v309_v10 }
 0x182   :  { %v344_v17 = vmax.f32 %v310_v13, 0.0 }
 0x183   :  { %v2124_v11 = vpop.f32.mrf.mxu1 }
 0x187   :  { %v311_v14 = vpop.f32.mrf.mxu0 }
 0x188   :  { %v312_v15 = vadd.f32 %v2025_v18, %v311_v14  ;;  %v2142_v18 = vld [vmem:[%s2673_s4] ss:$0 sm:$0xff]  ;;  %s1915_s4 = smov 32  }
 0x18a   :  { %v345_v19 = vmax.f32 %v312_v15, 0.0 }
 0x18b   :  { %v2134_v20 = vpop.f32.mrf.mxu1 }
 0x18c   :  { %v361_v21 = vpack.c.bf16 %v345_v19, %v344_v17 }
 0x18e   :  { %1620 = vmatmul.msk.bf16.gmra.mxu1 %vm382_vm2, %v361_v21 }
 0x18f   :  { %v440_v22 = vpop.f32.mrf.mxu0 }
 0x190   :  { %v2146_v28 = vadd.f32 %v2142_v18, %v440_v22 }
 0x192   :  { %v520_v33 = vmax.f32 %v2146_v28, 0.0 }
 0x193   :  { %v2137_v23 = vpop.f32.mrf.mxu1 }
 0x197   :  { %v442_v25 = vpop.f32.mrf.mxu0 }
 0x198   :  { %v2149_v24 = vadd.f32 %v2142_v18, %v442_v25 }
 0x19a   :  { %v521_v35 = vmax.f32 %v2149_v24, 0.0 }
 0x19b   :  { %v480_v26 = vpop.f32.mrf.mxu1 }
 0x19c   :  { %v481_v27 = vadd.f32 %v2142_v18, %v480_v26 }
 0x19e   :  { %v536_v30 = vmax.f32 %v481_v27, 0.0  ;;  %v2195_v27 = vadd.f32 %v2142_v18, %v2100_v46 }
 0x19f   :  { %v445_v29 = vpop.f32.mrf.mxu0 }
 0x1a0   :  { %v552_v36 = vsub.f32 %v520_v33, %v536_v30  ;;  %v2162_v40 = vadd.f32 %v2142_v18, %v445_v29  ;;  %v2199_v29 = vadd.f32 %v2142_v18, %v2103_v48 }
 0x1a2   :  { %v568_v39 = vand.u32 2147483647, %v552_v36  ;;  %v522_v51 = vmax.f32 %v2162_v40, 0.0 }
 0x1a3   :  { %v482_v31 = vpop.f32.mrf.mxu1 }
 0x1a4   :  { %v483_v34 = vadd.f32 %v2142_v18, %v482_v31 }
 0x1a6   :  { %v537_v32 = vmax.f32 %v483_v34, 0.0  ;;  %v526_v34 = vmax.f32 %v2195_v27, 0.0 }
 0x1a7   :  { %v447_v42 = vpop.f32.mrf.mxu0 }
 0x1a8   :  { %v553_v37 = vsub.f32 %v521_v35, %v537_v32  ;;  %v1831_v38 = vpack.i.bf16 %v537_v32, %v536_v30  ;;  %v2165_v47 = vadd.f32 %v2142_v18, %v447_v42  ;;  %v527_v32 = vmax.f32 %v2199_v29, 0.0 }
 0x1aa   :  { %v569_v41 = vand.u32 2147483647, %v553_v37  ;;  %1832 = vrot.lane.b32.xlu0 %v1831_v38, %s1915_s4  ;;  %v523_v55 = vmax.f32 %v2165_v47, 0.0 }
 0x1ab   :  { %v485_v43 = vpop.f32.mrf.mxu1 }
 0x1ac   :  { %v584_v44 = vpack.c.bf16 %v569_v41, %v568_v39  ;;  %v486_v45 = vadd.f32 %v2142_v18, %v485_v43 }
 0x1ae   :  { %1629 = vmatmul.msk.bf16.vlgmr.msra.gmra.mxu2 %vm382_vm2, %v584_v44  ;;  %v538_v49 = vmax.f32 %v486_v45, 0.0  ;;  %v2214_v45 = vadd.f32 %v2142_v18, %v2107_v54 }
 0x1af   :  { %v450_v53 = vpop.f32.mrf.mxu0 }
 0x1b0   :  { %v554_v56 = vsub.f32 %v522_v51, %v538_v49  ;;  %v2178_v5 = vadd.f32 %v2142_v18, %v450_v53  ;;  %v528_v53 = vmax.f32 %v2214_v45, 0.0 }
 0x1b2   :  { %v570_v61 = vand.u32 2147483647, %v554_v56  ;;  %v524_v10 = vmax.f32 %v2178_v5, 0.0 }
 0x1b3   :  { %v487_v50 = vpop.f32.mrf.mxu1 }
 0x1b4   :  { %v488_v52 = vadd.f32 %v2142_v18, %v487_v50 }
 0x1b6   :  { %v539_v58 = vmax.f32 %v488_v52, 0.0 }
 0x1b7   :  { %v452_v4 = vpop.f32.mrf.mxu0 }
 0x1b8   :  { %v555_v59 = vsub.f32 %v523_v55, %v539_v58  ;;  %v1841_v60 = vpack.i.bf16 %v539_v58, %v538_v49  ;;  %v2181_v6 = vadd.f32 %v2142_v18, %v452_v4  ;;  %v2218_v49 = vadd.f32 %v2142_v18, %v2110_v57 }
 0x1b9   :  { %v2233_v4 = vadd.f32 %v2142_v18, %v2114_v63 }
 0x1ba   :  { %v571_v62 = vand.u32 2147483647, %v555_v59  ;;  %1842 = vrot.lane.b32.xlu1 %v1841_v60, %s1915_s4  ;;  %v525_v13 = vmax.f32 %v2181_v6, 0.0  ;;  %v529_v58 = vmax.f32 %v2218_v49, 0.0 }
 0x1bb   :  { %v490_v0 = vpop.f32.mrf.mxu1 }
 0x1bc   :  { %v585_v1 = vpack.c.bf16 %v571_v62, %v570_v61  ;;  %v491_v3 = vadd.f32 %v2142_v18, %v490_v0 }
 0x1be   :  { %1630 = vmatmul.msk.bf16.gmra.mxu2 %vm382_vm2, %v585_v1  ;;  %v540_v7 = vmax.f32 %v491_v3, 0.0 }
 0x1c0   :  { %v556_v14 = vsub.f32 %v524_v10, %v540_v7 }
 0x1c2   :  { %v572_v19 = vand.u32 2147483647, %v556_v14  ;;  %v530_v14 = vmax.f32 %v2233_v4, 0.0 }
 0x1c3   :  { %v492_v9 = vpop.f32.mrf.mxu1 }
 0x1c4   :  { %v493_v12 = vadd.f32 %v2142_v18, %v492_v9 }
 0x1c6   :  { %v541_v15 = vmax.f32 %v493_v12, 0.0 }
 0x1c8   :  { %v557_v16 = vsub.f32 %v525_v13, %v541_v15  ;;  %v1851_v17 = vpack.i.bf16 %v541_v15, %v540_v7  ;;  %v2237_v7 = vadd.f32 %v2142_v18, %v2117_v2 }
 0x1ca   :  { %v573_v21 = vand.u32 2147483647, %v557_v16  ;;  %1852 = vrot.lane.b32.xlu2 %v1851_v17, %s1915_s4  ;;  %v531_v16 = vmax.f32 %v2237_v7, 0.0 }
 0x1cb   :  { %v495_v22 = vpop.f32.mrf.mxu1 }
 0x1cc   :  { %v586_v25 = vpack.c.bf16 %v573_v21, %v572_v19  ;;  %v496_v26 = vadd.f32 %v2142_v18, %v495_v22 }
 0x1ce   :  { %1631 = vmatmul.msk.bf16.gmra.mxu2 %vm382_vm2, %v586_v25  ;;  %v542_v30 = vmax.f32 %v496_v26, 0.0 }
 0x1d0   :  { %v558_v37 = vsub.f32 %v526_v34, %v542_v30 }
 0x1d2   :  { %v574_v41 = vand.u32 2147483647, %v558_v37 }
 0x1d3   :  { %v497_v31 = vpop.f32.mrf.mxu1 }
 0x1d4   :  { %v498_v36 = vadd.f32 %v2142_v18, %v497_v31  ;;  %v2252_v31 = vadd.f32 %v2142_v18, %v2121_v8 }
 0x1d6   :  { %v543_v38 = vmax.f32 %v498_v36, 0.0  ;;  %v2256_v36 = vadd.f32 %v2142_v18, %v2124_v11 }
 0x1d8   :  { %v559_v46 = vsub.f32 %v527_v32, %v543_v38  ;;  %v2208_v39 = vpack.i.bf16 %v543_v38, %v542_v30 }
 0x1da   :  { %v575_v48 = vand.u32 2147483647, %v559_v46  ;;  %v532_v46 = vmax.f32 %v2252_v31, 0.0 }
 0x1db   :  { %v500_v42 = vpop.f32.mrf.mxu1 }
 0x1dc   :  { %v587_v43 = vpack.c.bf16 %v575_v48, %v574_v41  ;;  %v501_v44 = vadd.f32 %v2142_v18, %v500_v42  ;;  %v533_v48 = vmax.f32 %v2256_v36, 0.0 }
 0x1de   :  { %1632 = vmatmul.msk.bf16.gmra.mxu2 %vm382_vm2, %v587_v43  ;;  %v544_v50 = vmax.f32 %v501_v44, 0.0 }
 0x1e0   :  { %v560_v59 = vsub.f32 %v528_v53, %v544_v50 }
 0x1e2   :  { %v576_v62 = vand.u32 2147483647, %v560_v59 }
 0x1e3   :  { %v502_v52 = vpop.f32.mrf.mxu1 }
 0x1e4   :  { %v503_v56 = vadd.f32 %v2142_v18, %v502_v52 }
 0x1e6   :  { %v545_v60 = vmax.f32 %v503_v56, 0.0 }
 0x1e8   :  { %v2225_v61 = vpack.i.bf16 %v545_v60, %v544_v50  ;;  %v561_v54 = vsub.f32 %v529_v58, %v545_v60  ;;  %v2271_v60 = vadd.f32 %v2142_v18, %v2134_v20 }
 0x1ea   :  { %v577_v57 = vand.u32 2147483647, %v561_v54  ;;  %v2275_v54 = vadd.f32 %v2142_v18, %v2137_v23 }
 0x1eb   :  { %v505_v0 = vpop.f32.mrf.mxu1 }
 0x1ec   :  { %v588_v1 = vpack.c.bf16 %v577_v57, %v576_v62  ;;  %v506_v3 = vadd.f32 %v2142_v18, %v505_v0  ;;  %v534_v0 = vmax.f32 %v2271_v60, 0.0 }
 0x1ee   :  { %1633 = vmatmul.msk.bf16.gmra.mxu2 %vm382_vm2, %v588_v1  ;;  %v546_v9 = vmax.f32 %v506_v3, 0.0  ;;  %v535_v3 = vmax.f32 %v2275_v54, 0.0 }
 0x1f0   :  { %v562_v17 = vsub.f32 %v530_v14, %v546_v9 }
 0x1f2   :  { %v578_v22 = vand.u32 2147483647, %v562_v17 }
 0x1f3   :  { %v507_v12 = vpop.f32.mrf.mxu1 }
 0x1f4   :  { %v508_v15 = vadd.f32 %v2142_v18, %v507_v12 }
 0x1f6   :  { %v547_v19 = vmax.f32 %v508_v15, 0.0 }
 0x1f8   :  { %v2244_v21 = vpack.i.bf16 %v547_v19, %v546_v9  ;;  %v563_v63 = vsub.f32 %v531_v16, %v547_v19 }
 0x1fa   :  { %v579_v2 = vand.u32 2147483647, %v563_v63 }
 0x1fb   :  { %v510_v25 = vpop.f32.mrf.mxu1 }
 0x1fc   :  { %v589_v26 = vpack.c.bf16 %v579_v2, %v578_v22  ;;  %v511_v30 = vadd.f32 %v2142_v18, %v510_v25 }
 0x1fe   :  { %1634 = vmatmul.msk.bf16.vlgmr.msra.gmra.mxu3 %vm382_vm2, %v589_v26  ;;  %v548_v37 = vmax.f32 %v511_v30, 0.0 }
 0x200   :  { %v564_v42 = vsub.f32 %v532_v46, %v548_v37 }
 0x202   :  { %v580_v50 = vand.u32 2147483647, %v564_v42 }
 0x203   :  { %v512_v38 = vpop.f32.mrf.mxu1 }
 0x204   :  { %v513_v41 = vadd.f32 %v2142_v18, %v512_v38 }
 0x206   :  { %v549_v43 = vmax.f32 %v513_v41, 0.0 }
 0x208   :  { %v2263_v44 = vpack.i.bf16 %v549_v43, %v548_v37  ;;  %v565_v8 = vsub.f32 %v533_v48, %v549_v43 }
 0x20a   :  { %v581_v11 = vand.u32 2147483647, %v565_v8 }
 0x20b   :  { %v515_v52 = vpop.f32.mrf.mxu1 }
 0x20c   :  { %v590_v56 = vpack.c.bf16 %v581_v11, %v580_v50  ;;  %v516_v59 = vadd.f32 %v2142_v18, %v515_v52 }
 0x20e   :  { %1635 = vmatmul.msk.bf16.gmra.mxu3 %vm382_vm2, %v590_v56  ;;  %v550_v62 = vmax.f32 %v516_v59, 0.0 }
 0x210   :  { %v566_v9 = vsub.f32 %v534_v0, %v550_v62 }
 0x212   :  { %v582_v17 = vand.u32 2147483647, %v566_v9 }
 0x213   :  { %v517_v57 = vpop.f32.mrf.mxu1 }
 0x214   :  { %v518_v1 = vadd.f32 %v2142_v18, %v517_v57  ;;  %v2290_v18 = vld [vmem:[%s2675_s6] ss:$0 sm:$0xff] }
 0x216   :  { %v551_v12 = vmax.f32 %v518_v1, 0.0 }
 0x218   :  { %v2282_v15 = vpack.i.bf16 %v551_v12, %v550_v62  ;;  %v567_v20 = vsub.f32 %v535_v3, %v551_v12  ;;  %v1808_v12 = vld [vmem:[%s2676_s7 + $0x28] sm:$0xff] }
 0x219   :  { %949 = vmatpush.bf16.msrb.mxu3 %v1808_v12 }
 0x21a   :  { %v583_v23 = vand.u32 2147483647, %v567_v20 }
 0x21c   :  { %v591_v19 = vpack.c.bf16 %v583_v23, %v582_v17 }
 0x21e   :  { %1636 = vmatmul.msk.bf16.gmra.mxu3 %vm382_vm2, %v591_v19 }
 0x231   :  { %v645_v63 = vpop.f32.mrf.mxu2 }
 0x232   :  { %v646_v22 = vadd.f32 %v2290_v18, %v645_v63 }
 0x234   :  { %v685_v26 = vmax.f32 %v646_v22, 0.0  ;;  %v1807_v22 = vld [vmem:[%s2676_s7 + $0x20] sm:$0xff] }
 0x235   :  { %950 = vmatpush.bf16.msrb.mxu3 %v1807_v22  ;;  %v1833_v22 = vpop.permute.xlu0 %1832 }
 0x239   :  { %v647_v2 = vpop.f32.mrf.mxu2 }
 0x23a   :  { %v648_v25 = vadd.f32 %v2290_v18, %v647_v2 }
 0x23c   :  { %v686_v30 = vmax.f32 %v648_v25, 0.0 }
 0x23e   :  { %v1836_v37 = vpack.i.bf16 %v686_v30, %v685_v26  ;;  %v1806_v26 = vld [vmem:[%s2676_s7 + $0x18] sm:$0xff] }
 0x23f   :  { %951 = vmatpush.bf16.msrb.mxu3 %v1806_v26 }
 0x240   :  { %1837 = vrot.lane.b32.xlu0 %v1836_v37, %s1916_s19 }
 0x241   :  { %v650_v38 = vpop.f32.mrf.mxu2 }
 0x242   :  { %v651_v41 = vadd.f32 %v2290_v18, %v650_v38 }
 0x244   :  { %v687_v8 = vmax.f32 %v651_v41, 0.0 }
 0x248   :  { %1862 = vrot.lane.b32.xlu0 %v2208_v39, %s1915_s4 }
 0x249   :  { %v652_v42 = vpop.f32.mrf.mxu2 }
 0x24a   :  { %v653_v43 = vadd.f32 %v2290_v18, %v652_v42  ;;  %v1805_v42 = vld [vmem:[%s2676_s7 + $0x10] sm:$0xff] }
 0x24b   :  { %952 = vmatpush.bf16.msrb.mxu3 %v1805_v42 }
 0x24c   :  { %v688_v50 = vmax.f32 %v653_v43, 0.0 }
 0x24e   :  { %v1846_v11 = vpack.i.bf16 %v688_v50, %v687_v8  ;;  %v1804_v50 = vld [vmem:[%s2676_s7 + $0x8] sm:$0xff] }
 0x24f   :  { %953 = vmatpush.bf16.msrb.mxu3 %v1804_v50 }
 0x250   :  { %1847 = vrot.lane.b32.xlu1 %v1846_v11, %s1916_s19 }
 0x251   :  { %v655_v52 = vpop.f32.mrf.mxu2 }
 0x252   :  { %v656_v56 = vadd.f32 %v2290_v18, %v655_v52 }
 0x254   :  { %v689_v57 = vmax.f32 %v656_v56, 0.0 }
 0x259   :  { %v657_v59 = vpop.f32.mrf.mxu2 }
 0x25a   :  { %v658_v62 = vadd.f32 %v2290_v18, %v657_v59 }
 0x25c   :  { %v690_v1 = vmax.f32 %v658_v62, 0.0  ;;  %v1803_v62 = vld [vmem:[%s2676_s7] sm:$0xff] }
 0x25d   :  { %954 = vmatpush.bf16.msrb.mxu3 %v1803_v62  ;;  %v1853_v62 = vpop.permute.xlu2 %1852 }
 0x25e   :  { %v1856_v9 = vpack.i.bf16 %v690_v1, %v689_v57 }
 0x260   :  { %1857 = vrot.lane.b32.xlu2 %v1856_v9, %s1916_s19 }
 0x261   :  { %v660_v39 = vpop.f32.mrf.mxu2 }
 0x262   :  { %v661_v20 = vadd.f32 %v2290_v18, %v660_v39 }
 0x264   :  { %v691_v19 = vmax.f32 %v661_v20, 0.0 }
 0x268   :  { %1872 = vrot.lane.b32.xlu2 %v2225_v61, %s1915_s4 }
 0x269   :  { %v662_v17 = vpop.f32.mrf.mxu2 }
 0x26a   :  { %v663_v23 = vadd.f32 %v2290_v18, %v662_v17 }
 0x26c   :  { %v692_v63 = vmax.f32 %v663_v23, 0.0 }
 0x26e   :  { %v1866_v2 = vpack.i.bf16 %v692_v63, %v691_v19 }
 0x270   :  { %1867 = vrot.lane.b32.xlu1 %v1866_v2, %s1916_s19 }
 0x271   :  { %v665_v25 = vpop.f32.mrf.mxu2 }
 0x272   :  { %v666_v61 = vadd.f32 %v2290_v18, %v665_v25 }
 0x274   :  { %v693_v38 = vmax.f32 %v666_v61, 0.0 }
 0x278   :  { %1882 = vrot.lane.b32.xlu1 %v2244_v21, %s1915_s4 }
 0x279   :  { %v667_v30 = vpop.f32.mrf.mxu2 }
 0x27a   :  { %v668_v37 = vadd.f32 %v2290_v18, %v667_v30  ;;  %v1835_v30 = vunpack.i.h.bf16 %v1833_v22 }
 0x27c   :  { %v694_v41 = vmax.f32 %v668_v37, 0.0 }
 0x27e   :  { %v1876_v43 = vpack.i.bf16 %v694_v41, %v693_v38 }
 0x280   :  { %1877 = vrot.lane.b32.xlu0 %v1876_v43, %s1916_s19  ;;  %v830_v43 = vsel %vm382_vm2, %v521_v35, %v1835_v30 }
 0x281   :  { %v670_v8 = vpop.f32.mrf.mxu3 }
 0x282   :  { %v671_v21 = vadd.f32 %v2290_v18, %v670_v8 }
 0x284   :  { %v695_v56 = vmax.f32 %v671_v21, 0.0  ;;  %v1843_v21 = vpop.permute.xlu1 %1842 }
 0x288   :  { %1892 = vrot.lane.b32.xlu0 %v2263_v44, %s1915_s4 }
 0x289   :  { %v672_v11 = vpop.f32.mrf.mxu3 }
 0x28a   :  { %v673_v52 = vadd.f32 %v2290_v18, %v672_v11  ;;  %v1845_v11 = vunpack.i.h.bf16 %v1843_v21 }
 0x28c   :  { %v696_v59 = vmax.f32 %v673_v52, 0.0  ;;  %v1844_v52 = vunpack.i.l.bf16 %v1843_v21 }
 0x28e   :  { %v1886_v57 = vpack.i.bf16 %v696_v59, %v695_v56  ;;  %v831_v24 = vsel %vm382_vm2, %v522_v51, %v1844_v52 }
 0x290   :  { %1887 = vrot.lane.b32.xlu2 %v1886_v57, %s1916_s19 }
 0x291   :  { %v675_v1 = vpop.f32.mrf.mxu3 }
 0x292   :  { %v676_v9 = vadd.f32 %v2290_v18, %v675_v1 }
 0x294   :  { %v697_v12 = vmax.f32 %v676_v9, 0.0 }
 0x298   :  { %1902 = vrot.lane.b32.xlu2 %v2282_v15, %s1915_s4  ;;  %v1834_v15 = vunpack.i.l.bf16 %v1833_v22 }
 0x299   :  { %v677_v44 = vpop.f32.mrf.mxu3 }
 0x29a   :  { %v678_v39 = vadd.f32 %v2290_v18, %v677_v44  ;;  %v829_v42 = vsel %vm382_vm2, %v520_v33, %v1834_v15  ;;  %v832_v33 = vsel %vm382_vm2, %v523_v55, %v1845_v11  ;;  %v1855_v44 = vunpack.i.h.bf16 %v1853_v62 }
 0x29c   :  { %v698_v20 = vmax.f32 %v678_v39, 0.0  ;;  %v1854_v39 = vunpack.i.l.bf16 %v1853_v62  ;;  %v834_v47 = vsel %vm382_vm2, %v525_v13, %v1855_v44 }
 0x29e   :  { %v1896_v17 = vpack.i.bf16 %v698_v20, %v697_v12  ;;  %v833_v40 = vsel %vm382_vm2, %v524_v10, %v1854_v39 }
 0x2a0   :  { %1897 = vrot.lane.b32.xlu1 %v1896_v17, %s1916_s19 }
 0x2a1   :  { %v680_v23 = vpop.f32.mrf.mxu3 }
 0x2a2   :  { %v681_v19 = vadd.f32 %v2290_v18, %v680_v23 }
 0x2a4   :  { %v699_v25 = vmax.f32 %v681_v19, 0.0 }
 0x2a9   :  { %v682_v63 = vpop.f32.mrf.mxu3 }
 0x2aa   :  { %v683_v2 = vadd.f32 %v2290_v18, %v682_v63 }
 0x2ac   :  { %v700_v26 = vmax.f32 %v683_v2, 0.0 }
 0x2ae   :  { %v1906_v61 = vpack.i.bf16 %v700_v26, %v699_v25 }
 0x2b0   :  { %1907 = vrot.lane.b32.xlu0 %v1906_v61, %s1916_s19 }
 0x2b2   :  { %v1838_v37 = vpop.permute.xlu0 %1837 }
 0x2b3   :  { %v1840_v38 = vunpack.i.h.bf16 %v1838_v37  ;;  %v1839_v41 = vunpack.i.l.bf16 %v1838_v37 }
 0x2b5   :  { %v847_v18 = vsel %vm845_vm3, %v830_v43, %v1840_v38  ;;  %v846_v8 = vsel %vm845_vm3, %v829_v42, %v1839_v41 }
 0x2b6   :  { %v862_v50 = vpack.c.bf16 %v847_v18, %v846_v8 }
 0x2b8   :  { %1661 = vmatmul.msk.bf16.vlgmr.msrb.gmra.mxu3 %vm922_vm4, %v862_v50 }
 0x2ba   :  { %v1858_v9 = vpop.permute.xlu2 %1857  ;;  %v1863_v23 = vpop.permute.xlu0 %1862 }
 0x2bb   :  { %v1860_v12 = vunpack.i.h.bf16 %v1858_v9  ;;  %v1859_v20 = vunpack.i.l.bf16 %v1858_v9  ;;  %v1865_v19 = vunpack.i.h.bf16 %v1863_v23  ;;  %v1864_v63 = vunpack.i.l.bf16 %v1863_v23 }
 0x2bd   :  { %v850_v51 = vsel %vm845_vm3, %v833_v40, %v1859_v20  ;;  %v851_v55 = vsel %vm845_vm3, %v834_v47, %v1860_v12  ;;  %v836_v5 = vsel %vm382_vm2, %v527_v32, %v1865_v19  ;;  %v835_v6 = vsel %vm382_vm2, %v526_v34, %v1864_v63  ;;  %v2419_v40 = vld [vmem:[%s2677_s8] ss:$0 sm:$0xff] }
 0x2be   :  { %v864_v17 = vpack.c.bf16 %v851_v55, %v850_v51 }
 0x2c2   :  { %v1848_v56 = vpop.permute.xlu1 %1847  ;;  %v1873_v61 = vpop.permute.xlu2 %1872 }
 0x2c3   :  { %v1850_v59 = vunpack.i.h.bf16 %v1848_v56  ;;  %v1849_v28 = vunpack.i.l.bf16 %v1848_v56  ;;  %v1875_v30 = vunpack.i.h.bf16 %v1873_v61  ;;  %v1874_v15 = vunpack.i.l.bf16 %v1873_v61  ;;  %v1816_v61 = vld [vmem:[%s2678_s9 + $0x34] sm:$0xf0] }
 0x2c5   :  { %v848_v35 = vsel %vm845_vm3, %v831_v24, %v1849_v28  ;;  %v849_v57 = vsel %vm845_vm3, %v832_v33, %v1850_v59  ;;  %v838_v29 = vsel %vm382_vm2, %v529_v58, %v1875_v30  ;;  %v837_v27 = vsel %vm382_vm2, %v528_v53, %v1874_v15 }
 0x2c6   :  { %v863_v1 = vpack.c.bf16 %v849_v57, %v848_v35 }
 0x2c8   :  { %1662 = vmatmul.msk.bf16.gmra.mxu3 %vm922_vm4, %v863_v1 }
 0x2d8   :  { %1663 = vmatmul.msk.bf16.gmra.mxu3 %vm922_vm4, %v864_v17 }
 0x2e2   :  { %v1868_v22 = vpop.permute.xlu1 %1867 }
 0x2e3   :  { %v1870_v2 = vunpack.i.h.bf16 %v1868_v22  ;;  %v1869_v25 = vunpack.i.l.bf16 %v1868_v22 }
 0x2e5   :  { %v852_v10 = vsel %vm845_vm3, %v835_v6, %v1869_v25  ;;  %v853_v13 = vsel %vm845_vm3, %v836_v5, %v1870_v2 }
 0x2e6   :  { %v865_v26 = vpack.c.bf16 %v853_v13, %v852_v10 }
 0x2e8   :  { %1664 = vmatmul.msk.bf16.gmra.mxu3 %vm922_vm4, %v865_v26  ;;  %v1695_v26 = vld [vmem:[%s2678_s9 + $0x30] sm:$0xf] }
 0x2e9   :  { %v1696_v30 = vor.u32 %v1816_v61, %v1695_v26 }
 0x2ea   :  { %v1883_v43 = vpop.permute.xlu1 %1882  ;;  %v1888_v18 = vpop.permute.xlu2 %1887 }
 0x2eb   :  { %v1885_v8 = vunpack.i.h.bf16 %v1883_v43  ;;  %v1884_v50 = vunpack.i.l.bf16 %v1883_v43  ;;  %v1890_v21 = vunpack.i.h.bf16 %v1888_v18  ;;  %v1889_v11 = vunpack.i.l.bf16 %v1888_v18  ;;  %1160 = vmatpush.bf16.msrb.mxu2 %v1696_v30  ;;  %v1687_v43 = vld [vmem:[%s2678_s9 + $0x20] sm:$0xf]  ;;  %v1814_v18 = vld [vmem:[%s2678_s9 + $0x24] sm:$0xf0] }
 0x2ed   :  { %v840_v49 = vsel %vm382_vm2, %v531_v16, %v1885_v8  ;;  %v839_v45 = vsel %vm382_vm2, %v530_v14, %v1884_v50  ;;  %v1688_v8 = vor.u32 %v1814_v18, %v1687_v43  ;;  %v1679_v50 = vld [vmem:[%s2678_s9 + $0x10] sm:$0xf] }
 0x2ee   :  { %v856_v53 = vsel %vm845_vm3, %v839_v45, %v1889_v11  ;;  %v857_v58 = vsel %vm845_vm3, %v840_v49, %v1890_v21  ;;  %v1812_v21 = vld [vmem:[%s2678_s9 + $0x14] sm:$0xf0]  ;;  %v1735_v11 = vld [vmem:[%s2678_s9 + $0x20] sm:$0xf]  ;;  %v1822_v45 = vld [vmem:[%s2678_s9 + $0x24] sm:$0xf0] }
 0x2ef   :  { %v867_v52 = vpack.c.bf16 %v857_v58, %v856_v53  ;;  %1161 = vmatpush.bf16.msrb.mxu2 %v1688_v8  ;;  %v1680_v49 = vor.u32 %v1812_v21, %v1679_v50  ;;  %v1671_v53 = vld [vmem:[%s2678_s9] sm:$0xf]  ;;  %v1736_v58 = vor.u32 %v1822_v45, %v1735_v11 }
 0x2f2   :  { %v1878_v37 = vpop.permute.xlu0 %1877  ;;  %v1903_v57 = vpop.permute.xlu2 %1902 }
 0x2f3   :  { %v1880_v38 = vunpack.i.h.bf16 %v1878_v37  ;;  %v1879_v41 = vunpack.i.l.bf16 %v1878_v37  ;;  %v1905_v1 = vunpack.i.h.bf16 %v1903_v57  ;;  %v1904_v9 = vunpack.i.l.bf16 %v1903_v57  ;;  %1162 = vmatpush.bf16.msrb.mxu2 %v1680_v49 }
 0x2f5   :  { %v854_v34 = vsel %vm845_vm3, %v837_v27, %v1879_v41  ;;  %v855_v32 = vsel %vm845_vm3, %v838_v29, %v1880_v38  ;;  %v844_v36 = vsel %vm382_vm2, %v535_v3, %v1905_v1  ;;  %v843_v31 = vsel %vm382_vm2, %v534_v0, %v1904_v9  ;;  %v1743_v38 = vld [vmem:[%s2678_s9 + $0x30] sm:$0xf]  ;;  %v1824_v41 = vld [vmem:[%s2678_s9 + $0x34] sm:$0xf0]  ;;  %v1813_v1 = vld [vmem:[%s2678_s9 + $0x24] sm:$0xf] }
 0x2f6   :  { %v866_v42 = vpack.c.bf16 %v855_v32, %v854_v34  ;;  %v1744_v29 = vor.u32 %v1824_v41, %v1743_v38  ;;  %v1689_v9 = vld [vmem:[%s2678_s9 + $0x28] sm:$0xf0] }
 0x2f8   :  { %1665 = vmatmul.msk.bf16.gmra.mxu3 %vm922_vm4, %v866_v42  ;;  %1378 = vmatpush.bf16.msrb.mxu1 %v1744_v29 }
 0x2fa   :  { %v1893_v56 = vpop.permute.xlu0 %1892 }
 0x2fb   :  { %v1895_v59 = vunpack.i.h.bf16 %v1893_v56  ;;  %v1894_v28 = vunpack.i.l.bf16 %v1893_v56  ;;  %v1815_v56 = vld [vmem:[%s2678_s9 + $0x34] sm:$0xf] }
 0x2fc   :  { %1379 = vmatpush.bf16.msrb.mxu1 %v1736_v58  ;;  %v1719_v58 = vld [vmem:[%s2678_s9] sm:$0xf] }
 0x2fd   :  { %v842_v7 = vsel %vm382_vm2, %v533_v48, %v1895_v59  ;;  %v841_v4 = vsel %vm382_vm2, %v532_v46, %v1894_v28  ;;  %v1697_v59 = vld [vmem:[%s2678_s9 + $0x38] sm:$0xf0] }
 0x2fe   :  { %v1700_v28 = vor.u32 %v1815_v56, %v1697_v59 }
 0x300   :  { %1209 = vmatpush.bf16.msra.mxu3 %v1700_v28 }
 0x308   :  { %1666 = vmatmul.msk.bf16.gmra.mxu3 %vm922_vm4, %v867_v52  ;;  %v1810_v52 = vld [vmem:[%s2678_s9 + $0x4] sm:$0xf0] }
 0x312   :  { %v1898_v62 = vpop.permute.xlu1 %1897 }
 0x313   :  { %v1900_v24 = vunpack.i.h.bf16 %v1898_v62  ;;  %v1899_v33 = vunpack.i.l.bf16 %v1898_v62 }
 0x315   :  { %v858_v14 = vsel %vm845_vm3, %v841_v4, %v1899_v33  ;;  %v859_v16 = vsel %vm845_vm3, %v842_v7, %v1900_v24  ;;  %v1672_v24 = vor.u32 %v1810_v52, %v1671_v53  ;;  %v1818_v52 = vld [vmem:[%s2678_s9 + $0x4] sm:$0xf0] }
 0x316   :  { %v868_v35 = vpack.c.bf16 %v859_v16, %v858_v14  ;;  %v1720_v56 = vor.u32 %v1818_v52, %v1719_v58 }
 0x317   :  { %1163 = vmatpush.bf16.msrb.mxu2 %v1672_v24 }
 0x318   :  { %1667 = vmatmul.msk.bf16.gmra.mxu3 %vm922_vm4, %v868_v35 }
 0x322   :  { %v1908_v44 = vpop.permute.xlu0 %1907 }
 0x323   :  { %v1910_v39 = vunpack.i.h.bf16 %v1908_v44  ;;  %v1909_v12 = vunpack.i.l.bf16 %v1908_v44  ;;  %v1692_v44 = vor.u32 %v1813_v1, %v1689_v9 }
 0x325   :  { %v860_v46 = vsel %vm845_vm3, %v843_v31, %v1909_v12  ;;  %v861_v48 = vsel %vm845_vm3, %v844_v36, %v1910_v39  ;;  %v1811_v39 = vld [vmem:[%s2678_s9 + $0x14] sm:$0xf]  ;;  %v1681_v12 = vld [vmem:[%s2678_s9 + $0x18] sm:$0xf0]  ;;  %1210 = vmatpush.bf16.msra.mxu3 %v1692_v44  ;;  %v1809_v31 = vld [vmem:[%s2678_s9 + $0x4] sm:$0xf] }
 0x326   :  { %v869_v20 = vpack.c.bf16 %v861_v48, %v860_v46  ;;  %v1684_v36 = vor.u32 %v1811_v39, %v1681_v12  ;;  %v1673_v46 = vld [vmem:[%s2678_s9 + $0x8] sm:$0xf0] }
 0x327   :  { %v1676_v48 = vor.u32 %v1809_v31, %v1673_v46 }
 0x328   :  { %1668 = vmatmul.msk.bf16.gmra.mxu3 %vm922_vm4, %v869_v20  ;;  %v1823_v20 = vld [vmem:[%s2678_s9 + $0x34] sm:$0xf] }
 0x329   :  { %1211 = vmatpush.bf16.msra.mxu3 %v1684_v36 }
 0x32d   :  { %1212 = vmatpush.bf16.msra.mxu3 %v1676_v48 }
 0x33b   :  { %v956_v47 = vpop.f32.mrf.mxu3 }
 0x33c   :  { %v957_v54 = vadd.f32 %v2419_v40, %v956_v47 }
 0x33e   :  { %996 = vxpose.xlu1.b32.start [1/16] %v957_v54, 128 }
 0x343   :  { %v958_v3 = vpop.f32.mrf.mxu3 }
 0x344   :  { %v959_v60 = vadd.f32 %v2419_v40, %v958_v3 }
 0x346   :  { %997 = vxpose.xlu1.b32.cont [2/16] %v959_v60, 128 }
 0x34b   :  { %v961_v0 = vpop.f32.mrf.mxu3 }
 0x34c   :  { %v962_v51 = vadd.f32 %v2419_v40, %v961_v0 }
 0x34e   :  { %998 = vxpose.xlu1.b32.cont [3/16] %v962_v51, 128 }
 0x353   :  { %v963_v55 = vpop.f32.mrf.mxu3 }
 0x354   :  { %v964_v17 = vadd.f32 %v2419_v40, %v963_v55 }
 0x356   :  { %999 = vxpose.xlu1.b32.cont [4/16] %v964_v17, 128 }
 0x35b   :  { %v966_v23 = vpop.f32.mrf.mxu3 }
 0x35c   :  { %v967_v19 = vadd.f32 %v2419_v40, %v966_v23  ;;  %v1727_v23 = vld [vmem:[%s2678_s9 + $0x10] sm:$0xf] }
 0x35e   :  { %1000 = vxpose.xlu1.b32.cont [5/16] %v967_v19, 128  ;;  %v1820_v19 = vld [vmem:[%s2678_s9 + $0x14] sm:$0xf0] }
 0x363   :  { %v968_v63 = vpop.f32.mrf.mxu3 }
 0x364   :  { %v969_v22 = vadd.f32 %v2419_v40, %v968_v63  ;;  %v1821_v63 = vld [vmem:[%s2678_s9 + $0x24] sm:$0xf] }
 0x366   :  { %1001 = vxpose.xlu1.b32.cont [6/16] %v969_v22, 128  ;;  %v1728_v22 = vor.u32 %v1820_v19, %v1727_v23 }
 0x368   :  { %1380 = vmatpush.bf16.msrb.mxu1 %v1728_v22 }
 0x36b   :  { %v971_v2 = vpop.f32.mrf.mxu3 }
 0x36c   :  { %v972_v25 = vadd.f32 %v2419_v40, %v971_v2  ;;  %v1737_v2 = vld [vmem:[%s2678_s9 + $0x28] sm:$0xf0]  ;;  %1381 = vmatpush.bf16.msrb.mxu1 %v1720_v56 }
 0x36e   :  { %1002 = vxpose.xlu1.b32.cont [7/16] %v972_v25, 128  ;;  %v1740_v25 = vor.u32 %v1821_v63, %v1737_v2 }
 0x373   :  { %v973_v5 = vpop.f32.mrf.mxu3 }
 0x374   :  { %v974_v6 = vadd.f32 %v2419_v40, %v973_v5 }
 0x376   :  { %1003 = vxpose.xlu1.b32.cont [8/16] %v974_v6, 128 }
 0x37b   :  { %v976_v10 = vpop.f32.mrf.mxu3 }
 0x37c   :  { %v977_v13 = vadd.f32 %v2419_v40, %v976_v10 }
 0x37e   :  { %1004 = vxpose.xlu1.b32.cont [9/16] %v977_v13, 128 }
 0x383   :  { %v978_v15 = vpop.f32.mrf.mxu3 }
 0x384   :  { %v979_v37 = vadd.f32 %v2419_v40, %v978_v15 }
 0x386   :  { %1005 = vxpose.xlu1.b32.cont [10/16] %v979_v37, 128 }
 0x38b   :  { %v981_v27 = vpop.f32.mrf.mxu3 }
 0x38c   :  { %v982_v34 = vadd.f32 %v2419_v40, %v981_v27 }
 0x38e   :  { %1006 = vxpose.xlu1.b32.cont [11/16] %v982_v34, 128 }
 0x393   :  { %v983_v32 = vpop.f32.mrf.mxu3 }
 0x394   :  { %v984_v42 = vadd.f32 %v2419_v40, %v983_v32  ;;  %v1819_v32 = vld [vmem:[%s2678_s9 + $0x14] sm:$0xf] }
 0x396   :  { %1007 = vxpose.xlu1.b32.cont [12/16] %v984_v42, 128  ;;  %v1729_v42 = vld [vmem:[%s2678_s9 + $0x18] sm:$0xf0] }
 0x397   :  { %v1732_v43 = vor.u32 %v1819_v32, %v1729_v42 }
 0x39b   :  { %v986_v62 = vpop.f32.mrf.mxu3 }
 0x39c   :  { %v987_v33 = vadd.f32 %v2419_v40, %v986_v62 }
 0x39e   :  { %1008 = vxpose.xlu1.b32.cont [13/16] %v987_v33, 128 }
 0x3a3   :  { %v988_v7 = vpop.f32.mrf.mxu3 }
 0x3a4   :  { %v989_v4 = vadd.f32 %v2419_v40, %v988_v7 }
 0x3a6   :  { %1009 = vxpose.xlu1.b32.cont [14/16] %v989_v4, 128  ;;  %v1817_v4 = vld [vmem:[%s2678_s9 + $0x4] sm:$0xf] }
 0x3ab   :  { %v991_v14 = vpop.f32.mrf.mxu3 }
 0x3ac   :  { %v992_v16 = vadd.f32 %v2419_v40, %v991_v14  ;;  %v1721_v14 = vld [vmem:[%s2678_s9 + $0x8] sm:$0xf0] }
 0x3ae   :  { %1010 = vxpose.xlu1.b32.cont [15/16] %v992_v16, 128  ;;  %v1724_v16 = vor.u32 %v1817_v4, %v1721_v14 }
 0x3b3   :  { %v993_v35 = vpop.f32.mrf.mxu3 }
 0x3b4   :  { %v994_v57 = vadd.f32 %v2419_v40, %v993_v35  ;;  %v1745_v40 = vld [vmem:[%s2678_s9 + $0x38] sm:$0xf0] }
 0x3b5   :  { %v1748_v47 = vor.u32 %v1823_v20, %v1745_v40 }
 0x3b6   :  { %1011 = vxpose.xlu1.b32.end [16/16] %v994_v57, 128 }
 0x3b7   :  { %1427 = vmatpush.bf16.msra.mxu2 %v1748_v47 }
 0x3bb   :  { %1428 = vmatpush.bf16.msra.mxu2 %v1740_v25 }
 0x3bf   :  { %1429 = vmatpush.bf16.msra.mxu2 %v1732_v43 }
 0x3c3   :  { %1430 = vmatpush.bf16.msra.mxu2 %v1724_v16 }
 0x3e2   :  { %v1012_v54 = vpop.trf.xlu1 }
 0x3e3   :  { %v1028_v3 = vpack.c.bf16 %v1012_v54, %v1012_v54 }
 0x3e5   :  { %v1068_v51 = vunpack.c.l.b16 %v1028_v3 }
 0x3ea   :  { %v1013_v60 = vpop.trf.xlu1 }
 0x3eb   :  { %v1029_v0 = vpack.c.bf16 %v1013_v60, %v1013_v60 }
 0x3ed   :  { %v1069_v55 = vunpack.c.l.b16 %v1029_v0 }
 0x3ef   :  { %v1084_v17 = vpack.c.b16 %v1069_v55, %v1068_v51 }
 0x3f1   :  { %1294 = vrot.lane.b32.xlu2 %v1084_v17, %s1916_s19  ;;  %1701 = vmatmul.msk.bf16.vlgmr.msrb.gmra.mxu2 %vm845_vm3, %v1084_v17 }
 0x3f2   :  { %1709 = vmatmul.msk.bf16.vlgmr.msra.gmra.mxu3 %vm845_vm3, %v1084_v17  ;;  %v1014_v5 = vpop.trf.xlu1 }
 0x3f3   :  { %v1030_v6 = vpack.c.bf16 %v1014_v5, %v1014_v5 }
 0x3f5   :  { %v1070_v26 = vunpack.c.l.b16 %v1030_v6 }
 0x3fa   :  { %v1015_v10 = vpop.trf.xlu1 }
 0x3fb   :  { %v1031_v13 = vpack.c.bf16 %v1015_v10, %v1015_v10 }
 0x3fd   :  { %v1071_v61 = vunpack.c.l.b16 %v1031_v13 }
 0x3ff   :  { %v1085_v30 = vpack.c.b16 %v1071_v61, %v1070_v26 }
 0x401   :  { %1296 = vrot.lane.b32.xlu0 %v1085_v30, %s1916_s19  ;;  %1702 = vmatmul.msk.bf16.gmra.mxu2 %vm845_vm3, %v1085_v30 }
 0x402   :  { %1710 = vmatmul.msk.bf16.gmra.mxu3 %vm845_vm3, %v1085_v30  ;;  %v1016_v15 = vpop.trf.xlu1 }
 0x403   :  { %v1032_v37 = vpack.c.bf16 %v1016_v15, %v1016_v15 }
 0x405   :  { %v1072_v29 = vunpack.c.l.b16 %v1032_v37 }
 0x40a   :  { %v1017_v38 = vpop.trf.xlu1 }
 0x40b   :  { %v1033_v41 = vpack.c.bf16 %v1017_v38, %v1017_v38 }
 0x40d   :  { %v1073_v27 = vunpack.c.l.b16 %v1033_v41 }
 0x40f   :  { %v1086_v34 = vpack.c.b16 %v1073_v27, %v1072_v29 }
 0x411   :  { %1298 = vrot.lane.b32.xlu2 %v1086_v34, %s1916_s19  ;;  %1703 = vmatmul.msk.bf16.gmra.mxu2 %vm845_vm3, %v1086_v34 }
 0x412   :  { %1711 = vmatmul.msk.bf16.gmra.mxu3 %vm845_vm3, %v1086_v34  ;;  %v1018_v18 = vpop.trf.xlu1 }
 0x413   :  { %v1034_v8 = vpack.c.bf16 %v1018_v18, %v1018_v18 }
 0x415   :  { %v1074_v11 = vunpack.c.l.b16 %v1034_v8 }
 0x41a   :  { %v1019_v50 = vpop.trf.xlu1 }
 0x41b   :  { %v1035_v21 = vpack.c.bf16 %v1019_v50, %v1019_v50 }
 0x41d   :  { %v1075_v49 = vunpack.c.l.b16 %v1035_v21 }
 0x41f   :  { %v1087_v45 = vpack.c.b16 %v1075_v49, %v1074_v11 }
 0x421   :  { %1300 = vrot.lane.b32.xlu0 %v1087_v45, %s1916_s19  ;;  %1704 = vmatmul.msk.bf16.gmra.mxu2 %vm845_vm3, %v1087_v45 }
 0x422   :  { %1712 = vmatmul.msk.bf16.gmra.mxu3 %vm845_vm3, %v1087_v45  ;;  %v1020_v53 = vpop.trf.xlu1 }
 0x423   :  { %v1036_v59 = vpack.c.bf16 %v1020_v53, %v1020_v53 }
 0x425   :  { %v1076_v24 = vunpack.c.l.b16 %v1036_v59 }
 0x42a   :  { %v1021_v28 = vpop.trf.xlu1 }
 0x42b   :  { %v1037_v62 = vpack.c.bf16 %v1021_v28, %v1021_v28 }
 0x42d   :  { %v1077_v33 = vunpack.c.l.b16 %v1037_v62 }
 0x42f   :  { %v1088_v7 = vpack.c.b16 %v1077_v33, %v1076_v24 }
 0x431   :  { %1302 = vrot.lane.b32.xlu2 %v1088_v7, %s1916_s19  ;;  %1705 = vmatmul.msk.bf16.gmra.mxu2 %vm845_vm3, %v1088_v7 }
 0x432   :  { %1713 = vmatmul.msk.bf16.gmra.mxu3 %vm845_vm3, %v1088_v7  ;;  %v1022_v35 = vpop.trf.xlu1 }
 0x433   :  { %v1038_v57 = vpack.c.bf16 %v1022_v35, %v1022_v35 }
 0x435   :  { %v1078_v44 = vunpack.c.l.b16 %v1038_v57 }
 0x43a   :  { %v1023_v1 = vpop.trf.xlu1 }
 0x43b   :  { %v1039_v9 = vpack.c.bf16 %v1023_v1, %v1023_v1 }
 0x43d   :  { %v1079_v39 = vunpack.c.l.b16 %v1039_v9 }
 0x43f   :  { %v1089_v12 = vpack.c.b16 %v1079_v39, %v1078_v44 }
 0x441   :  { %1304 = vrot.lane.b32.xlu0 %v1089_v12, %s1916_s19  ;;  %1706 = vmatmul.msk.bf16.gmra.mxu2 %vm845_vm3, %v1089_v12 }
 0x442   :  { %1714 = vmatmul.msk.bf16.gmra.mxu3 %vm845_vm3, %v1089_v12  ;;  %v1024_v36 = vpop.trf.xlu1 }
 0x443   :  { %v1040_v31 = vpack.c.bf16 %v1024_v36, %v1024_v36 }
 0x445   :  { %v1080_v40 = vunpack.c.l.b16 %v1040_v31 }
 0x44a   :  { %v1025_v46 = vpop.trf.xlu1 }
 0x44b   :  { %v1041_v48 = vpack.c.bf16 %v1025_v46, %v1025_v46  ;;  %v1295_v20 = vpop.permute.xlu2 %1294 }
 0x44c   :  { %1749 = vmatmul.msk.bf16.vlgmr.msrb.gmra.mxu1 %vm845_vm3, %v1295_v20 }
 0x44d   :  { %v1081_v47 = vunpack.c.l.b16 %v1041_v48 }
 0x44f   :  { %v1090_v54 = vpack.c.b16 %v1081_v47, %v1080_v40 }
 0x451   :  { %1306 = vrot.lane.b32.xlu2 %v1090_v54, %s1916_s19  ;;  %1707 = vmatmul.msk.bf16.gmra.mxu2 %vm845_vm3, %v1090_v54 }
 0x452   :  { %1715 = vmatmul.msk.bf16.gmra.mxu3 %vm845_vm3, %v1090_v54  ;;  %v1026_v3 = vpop.trf.xlu1 }
 0x453   :  { %v1042_v60 = vpack.c.bf16 %v1026_v3, %v1026_v3 }
 0x455   :  { %v1082_v55 = vunpack.c.l.b16 %v1042_v60 }
 0x45a   :  { %v1027_v0 = vpop.trf.xlu1 }
 0x45b   :  { %v1043_v51 = vpack.c.bf16 %v1027_v0, %v1027_v0 }
 0x45d   :  { %v1083_v17 = vunpack.c.l.b16 %v1043_v51 }
 0x45f   :  { %v1091_v23 = vpack.c.b16 %v1083_v17, %v1082_v55 }
 0x461   :  { %1308 = vrot.lane.b32.xlu0 %v1091_v23, %s1916_s19  ;;  %1708 = vmatmul.msk.bf16.gmra.mxu2 %vm845_vm3, %v1091_v23 }
 0x462   :  { %1716 = vmatmul.msk.bf16.gmra.mxu3 %vm845_vm3, %v1091_v23 }
 0x46b   :  { %v1299_v10 = vpop.permute.xlu2 %1298 }
 0x471   :  { %1757 = vmatmul.msk.bf16.vlgmr.msra.gmra.mxu2 %vm845_vm3, %v1295_v20 }
 0x473   :  { %v1297_v19 = vpop.permute.xlu0 %1296 }
 0x474   :  { %v1165_v63 = vpop.f32.mrf.mxu2  ;;  %1750 = vmatmul.msk.bf16.gmra.mxu1 %vm845_vm3, %v1297_v19 }
 0x475   :  { %v1214_v22 = vpop.f32.mrf.mxu3 }
 0x476   :  { %v1254_v2 = vpack.c.bf16 %v1214_v22, %v1165_v63 }
 0x478   :  { %1270 = vst [vmem:[%s2679_s10] sm:$0xff] %v1254_v2 }
 0x47c   :  { %v1167_v25 = vpop.f32.mrf.mxu2 }
 0x47d   :  { %v1216_v5 = vpop.f32.mrf.mxu3 }
 0x47e   :  { %v1255_v6 = vpack.c.bf16 %v1216_v5, %v1167_v25 }
 0x480   :  { %1271 = vst [vmem:[%s2679_s10 + $0x8] sm:$0xff] %v1255_v6 }
 0x481   :  { %1758 = vmatmul.msk.bf16.gmra.mxu2 %vm845_vm3, %v1297_v19 }
 0x484   :  { %v1170_v13 = vpop.f32.mrf.mxu2  ;;  %1751 = vmatmul.msk.bf16.gmra.mxu1 %vm845_vm3, %v1299_v10 }
 0x485   :  { %v1219_v26 = vpop.f32.mrf.mxu3 }
 0x486   :  { %v1256_v61 = vpack.c.bf16 %v1219_v26, %v1170_v13 }
 0x488   :  { %1272 = vst [vmem:[%s2679_s10 + $0x10] sm:$0xff] %v1256_v61 }
 0x48b   :  { %v1303_v43 = vpop.permute.xlu2 %1302 }
 0x48c   :  { %v1172_v30 = vpop.f32.mrf.mxu2 }
 0x48d   :  { %v1221_v15 = vpop.f32.mrf.mxu3 }
 0x48e   :  { %v1257_v37 = vpack.c.bf16 %v1221_v15, %v1172_v30 }
 0x490   :  { %1273 = vst [vmem:[%s2679_s10 + $0x18] sm:$0xff] %v1257_v37 }
 0x491   :  { %1759 = vmatmul.msk.bf16.gmra.mxu2 %vm845_vm3, %v1299_v10 }
 0x493   :  { %v1301_v38 = vpop.permute.xlu0 %1300 }
 0x494   :  { %v1175_v41 = vpop.f32.mrf.mxu2  ;;  %1752 = vmatmul.msk.bf16.gmra.mxu1 %vm845_vm3, %v1301_v38 }
 0x495   :  { %v1224_v29 = vpop.f32.mrf.mxu3 }
 0x496   :  { %v1258_v27 = vpack.c.bf16 %v1224_v29, %v1175_v41 }
 0x498   :  { %1274 = vst [vmem:[%s2679_s10 + $0x20] sm:$0xff] %v1258_v27 }
 0x49c   :  { %v1177_v34 = vpop.f32.mrf.mxu2 }
 0x49d   :  { %v1226_v32 = vpop.f32.mrf.mxu3 }
 0x49e   :  { %v1259_v42 = vpack.c.bf16 %v1226_v32, %v1177_v34 }
 0x4a0   :  { %1275 = vst [vmem:[%s2679_s10 + $0x28] sm:$0xff] %v1259_v42 }
 0x4a1   :  { %1760 = vmatmul.msk.bf16.gmra.mxu2 %vm845_vm3, %v1301_v38 }
 0x4a4   :  { %v1180_v18 = vpop.f32.mrf.mxu2  ;;  %1753 = vmatmul.msk.bf16.gmra.mxu1 %vm845_vm3, %v1303_v43 }
 0x4a5   :  { %v1229_v8 = vpop.f32.mrf.mxu3 }
 0x4a6   :  { %v1260_v50 = vpack.c.bf16 %v1229_v8, %v1180_v18 }
 0x4a8   :  { %1276 = vst [vmem:[%s2679_s10 + $0x30] sm:$0xff] %v1260_v50 }
 0x4ab   :  { %v1307_v62 = vpop.permute.xlu2 %1306 }
 0x4ac   :  { %v1182_v21 = vpop.f32.mrf.mxu2 }
 0x4ad   :  { %v1231_v11 = vpop.f32.mrf.mxu3 }
 0x4ae   :  { %v1261_v49 = vpack.c.bf16 %v1231_v11, %v1182_v21 }
 0x4b0   :  { %1277 = vst [vmem:[%s2679_s10 + $0x38] sm:$0xff] %v1261_v49 }
 0x4b1   :  { %1761 = vmatmul.msk.bf16.gmra.mxu2 %vm845_vm3, %v1303_v43 }
 0x4b3   :  { %v1305_v45 = vpop.permute.xlu0 %1304 }
 0x4b4   :  { %v1185_v53 = vpop.f32.mrf.mxu2  ;;  %1754 = vmatmul.msk.bf16.gmra.mxu1 %vm845_vm3, %v1305_v45 }
 0x4b5   :  { %v1234_v58 = vpop.f32.mrf.mxu3 }
 0x4b6   :  { %v1262_v52 = vpack.c.bf16 %v1234_v58, %v1185_v53 }
 0x4b8   :  { %1278 = vst [vmem:[%s2679_s10 + $0x40] sm:$0xff] %v1262_v52 }
 0x4bc   :  { %v1187_v56 = vpop.f32.mrf.mxu2 }
 0x4bd   :  { %v1236_v59 = vpop.f32.mrf.mxu3 }
 0x4be   :  { %v1263_v28 = vpack.c.bf16 %v1236_v59, %v1187_v56 }
 0x4c0   :  { %1279 = vst [vmem:[%s2679_s10 + $0x48] sm:$0xff] %v1263_v28 }
 0x4c1   :  { %1762 = vmatmul.msk.bf16.gmra.mxu2 %vm845_vm3, %v1305_v45 }
 0x4c4   :  { %v1190_v24 = vpop.f32.mrf.mxu2  ;;  %1755 = vmatmul.msk.bf16.gmra.mxu1 %vm845_vm3, %v1307_v62 }
 0x4c5   :  { %v1239_v33 = vpop.f32.mrf.mxu3 }
 0x4c6   :  { %v1264_v7 = vpack.c.bf16 %v1239_v33, %v1190_v24 }
 0x4c8   :  { %1280 = vst [vmem:[%s2679_s10 + $0x50] sm:$0xff] %v1264_v7 }
 0x4c9   :  { %v1383_v36 = vpop.f32.mrf.mxu1 }
 0x4cc   :  { %v1192_v4 = vpop.f32.mrf.mxu2 }
 0x4cd   :  { %v1241_v14 = vpop.f32.mrf.mxu3 }
 0x4ce   :  { %v1265_v16 = vpack.c.bf16 %v1241_v14, %v1192_v4 }
 0x4d0   :  { %1281 = vst [vmem:[%s2679_s10 + $0x58] sm:$0xff] %v1265_v16 }
 0x4d1   :  { %1763 = vmatmul.msk.bf16.gmra.mxu2 %vm845_vm3, %v1307_v62  ;;  %v1385_v20 = vpop.f32.mrf.mxu1 }
 0x4d3   :  { %v1309_v35 = vpop.permute.xlu0 %1308 }
 0x4d4   :  { %v1195_v57 = vpop.f32.mrf.mxu2  ;;  %1756 = vmatmul.msk.bf16.gmra.mxu1 %vm845_vm3, %v1309_v35 }
 0x4d5   :  { %v1244_v1 = vpop.f32.mrf.mxu3 }
 0x4d6   :  { %v1266_v9 = vpack.c.bf16 %v1244_v1, %v1195_v57 }
 0x4d8   :  { %1282 = vst [vmem:[%s2679_s10 + $0x60] sm:$0xff] %v1266_v9 }
 0x4dc   :  { %v1197_v44 = vpop.f32.mrf.mxu2 }
 0x4dd   :  { %v1246_v39 = vpop.f32.mrf.mxu3 }
 0x4de   :  { %v1267_v12 = vpack.c.bf16 %v1246_v39, %v1197_v44 }
 0x4e0   :  { %1283 = vst [vmem:[%s2679_s10 + $0x68] sm:$0xff] %v1267_v12 }
 0x4e1   :  { %1764 = vmatmul.msk.bf16.gmra.mxu2 %vm845_vm3, %v1309_v35 }
 0x4e4   :  { %v1200_v31 = vpop.f32.mrf.mxu2 }
 0x4e5   :  { %v1249_v46 = vpop.f32.mrf.mxu3 }
 0x4e6   :  { %v1268_v48 = vpack.c.bf16 %v1249_v46, %v1200_v31 }
 0x4e8   :  { %1284 = vst [vmem:[%s2679_s10 + $0x70] sm:$0xff] %v1268_v48 }
 0x4ec   :  { %v1202_v40 = vpop.f32.mrf.mxu2 }
 0x4ed   :  { %v1251_v47 = vpop.f32.mrf.mxu3 }
 0x4ee   :  { %v1269_v54 = vpack.c.bf16 %v1251_v47, %v1202_v40 }
 0x4f0   :  { %1285 = vst [vmem:[%s2679_s10 + $0x78] sm:$0xff] %v1269_v54 }
 0x4f1   :  { %v1388_v3 = vpop.f32.mrf.mxu1 }
 0x4f4   :  { %v1432_v60 = vpop.f32.mrf.mxu2 }
 0x4f5   :  { %v1472_v0 = vpack.c.bf16 %v1432_v60, %v1383_v36 }
 0x4f7   :  { %1765 = vst [vmem:[%s2679_s10 + $0x80] sm:$0xff] %v1472_v0 }
 0x4f9   :  { %v1390_v51 = vpop.f32.mrf.mxu1 }
 0x4fc   :  { %v1434_v55 = vpop.f32.mrf.mxu2 }
 0x4fd   :  { %v1473_v17 = vpack.c.bf16 %v1434_v55, %v1385_v20 }
 0x4ff   :  { %1766 = vst [vmem:[%s2679_s10 + $0x88] sm:$0xff] %v1473_v17 }
 0x501   :  { %v1393_v23 = vpop.f32.mrf.mxu1 }
 0x504   :  { %v1437_v19 = vpop.f32.mrf.mxu2 }
 0x505   :  { %v1474_v63 = vpack.c.bf16 %v1437_v19, %v1388_v3 }
 0x507   :  { %1767 = vst [vmem:[%s2679_s10 + $0x90] sm:$0xff] %v1474_v63 }
 0x509   :  { %v1395_v22 = vpop.f32.mrf.mxu1 }
 0x50c   :  { %v1439_v2 = vpop.f32.mrf.mxu2 }
 0x50d   :  { %v1475_v25 = vpack.c.bf16 %v1439_v2, %v1390_v51 }
 0x50f   :  { %1768 = vst [vmem:[%s2679_s10 + $0x98] sm:$0xff] %v1475_v25 }
 0x511   :  { %v1398_v5 = vpop.f32.mrf.mxu1 }
 0x514   :  { %v1442_v6 = vpop.f32.mrf.mxu2 }
 0x515   :  { %v1476_v10 = vpack.c.bf16 %v1442_v6, %v1393_v23 }
 0x517   :  { %1769 = vst [vmem:[%s2679_s10 + $0xa0] sm:$0xff] %v1476_v10 }
 0x519   :  { %v1400_v13 = vpop.f32.mrf.mxu1 }
 0x51c   :  { %v1444_v26 = vpop.f32.mrf.mxu2 }
 0x51d   :  { %v1477_v61 = vpack.c.bf16 %v1444_v26, %v1395_v22 }
 0x51f   :  { %1770 = vst [vmem:[%s2679_s10 + $0xa8] sm:$0xff] %v1477_v61 }
 0x521   :  { %v1403_v37 = vpop.f32.mrf.mxu1 }
 0x524   :  { %v1447_v30 = vpop.f32.mrf.mxu2 }
 0x525   :  { %v1478_v15 = vpack.c.bf16 %v1447_v30, %v1398_v5 }
 0x527   :  { %1771 = vst [vmem:[%s2679_s10 + $0xb0] sm:$0xff] %v1478_v15 }
 0x529   :  { %v1405_v29 = vpop.f32.mrf.mxu1 }
 0x52c   :  { %v1449_v38 = vpop.f32.mrf.mxu2 }
 0x52d   :  { %v1479_v41 = vpack.c.bf16 %v1449_v38, %v1400_v13 }
 0x52f   :  { %1772 = vst [vmem:[%s2679_s10 + $0xb8] sm:$0xff] %v1479_v41 }
 0x531   :  { %v1408_v32 = vpop.f32.mrf.mxu1 }
 0x534   :  { %v1452_v27 = vpop.f32.mrf.mxu2 }
 0x535   :  { %v1480_v34 = vpack.c.bf16 %v1452_v27, %v1403_v37 }
 0x537   :  { %1773 = vst [vmem:[%s2679_s10 + $0xc0] sm:$0xff] %v1480_v34 }
 0x539   :  { %v1410_v18 = vpop.f32.mrf.mxu1 }
 0x53c   :  { %v1454_v42 = vpop.f32.mrf.mxu2 }
 0x53d   :  { %v1481_v43 = vpack.c.bf16 %v1454_v42, %v1405_v29 }
 0x53f   :  { %1774 = vst [vmem:[%s2679_s10 + $0xc8] sm:$0xff] %v1481_v43 }
 0x541   :  { %v1413_v49 = vpop.f32.mrf.mxu1 }
 0x544   :  { %v1457_v8 = vpop.f32.mrf.mxu2 }
 0x545   :  { %v1482_v50 = vpack.c.bf16 %v1457_v8, %v1408_v32 }
 0x547   :  { %1775 = vst [vmem:[%s2679_s10 + $0xd0] sm:$0xff] %v1482_v50 }
 0x549   :  { %v1415_v58 = vpop.f32.mrf.mxu1 }
 0x54c   :  { %v1459_v21 = vpop.f32.mrf.mxu2 }
 0x54d   :  { %v1483_v11 = vpack.c.bf16 %v1459_v21, %v1410_v18 }
 0x54f   :  { %1776 = vst [vmem:[%s2679_s10 + $0xd8] sm:$0xff] %v1483_v11 }
 0x551   :  { %v1418_v59 = vpop.f32.mrf.mxu1 }
 0x554   :  { %v1462_v45 = vpop.f32.mrf.mxu2 }
 0x555   :  { %v1484_v53 = vpack.c.bf16 %v1462_v45, %v1413_v49 }
 0x557   :  { %1777 = vst [vmem:[%s2679_s10 + $0xe0] sm:$0xff] %v1484_v53 }
 0x559   :  { %v1420_v24 = vpop.f32.mrf.mxu1 }
 0x55c   :  { %v1464_v52 = vpop.f32.mrf.mxu2 }
 0x55d   :  { %v1485_v56 = vpack.c.bf16 %v1464_v52, %v1415_v58 }
 0x55f   :  { %1778 = vst [vmem:[%s2679_s10 + $0xe8] sm:$0xff] %v1485_v56 }
 0x564   :  { %v1467_v28 = vpop.f32.mrf.mxu2 }
 0x565   :  { %v1486_v62 = vpack.c.bf16 %v1467_v28, %v1418_v59 }
 0x567   :  { %1779 = vst [vmem:[%s2679_s10 + $0xf0] sm:$0xff] %v1486_v62 }
 0x56c   :  { %v1469_v33 = vpop.f32.mrf.mxu2 }
 0x56d   :  { %v1487_v7 = vpack.c.bf16 %v1469_v33, %v1420_v24 }
 0x56f   :  { %1780 = vst [vmem:[%s2679_s10 + $0xf8] sm:$0xff] %v1487_v7 }

</bundles_post_ra>
